<compile_context>
chip_gen: v7x
topology: tpu7x:2x2x1
jax: 0.10.0
libtpu: 0.0.40
codegen_flags: <defaults>
</compile_context>

<pallas_src>
from functools import partial

import jax
import jax.numpy as jnp
from jax.experimental import pallas as pl
from jax.experimental.pallas import tpu as pltpu


D_IN = 28 * 28        # 784
D_H = 400
N_CLASSES = 10
C_PAD = 128           # lane-dense padded class dimension


# ----------------------------------------------------------------------------
# Pallas kernel: fused 3-layer MLP + log_softmax (per batch tile)
# ----------------------------------------------------------------------------
def _bnn_kernel(x_ref, w1_ref, b1_ref, w2_ref, b2_ref, w3_ref, b3_ref, out_ref):
    x = x_ref[...]                                                    # bf16 [TB, 784]

    h1 = jnp.dot(x, w1_ref[...], preferred_element_type=jnp.float32) + b1_ref[...]
    h1 = jnp.maximum(h1, 0.0).astype(jnp.bfloat16)                    # [TB, 400]

    h2 = jnp.dot(h1, w2_ref[...], preferred_element_type=jnp.float32) + b2_ref[...]
    h2 = jnp.maximum(h2, 0.0).astype(jnp.bfloat16)                    # [TB, 400]

    # Padded class lanes: w3 pad columns are 0 and b3 pad lanes are -1e30, so
    # padded logits are ~-1e30 and contribute exp(.) == 0 to the normalizer.
    logits = jnp.dot(h2, w3_ref[...], preferred_element_type=jnp.float32) + b3_ref[...]
    m = jnp.max(logits, axis=-1, keepdims=True)
    z = logits - m
    lse = jnp.log(jnp.sum(jnp.exp(z), axis=-1, keepdims=True))
    out_ref[...] = (z - lse).astype(out_ref.dtype)                    # [TB, 128]


def _bnn_pallas_call(x_pad, w1, b1, w2, b2, w3p, b3p, tb):
    bp = x_pad.shape[0]
    n_tiles = bp // tb

    flops = 2 * bp * (D_IN * D_H + D_H * D_H + D_H * C_PAD)
    bytes_accessed = (
        x_pad.size * 2                                   # bf16 activations in
        + (w1.size + w2.size + w3p.size) * 2             # bf16 weights
        + (b1.size + b2.size + b3p.size) * 4             # f32 biases
        + bp * C_PAD * 4                                  # f32 output slab
    )
    transcendentals = bp * (C_PAD + 1)                    # exp + log per row

    grid_spec = pltpu.PrefetchScalarGridSpec(
        num_scalar_prefetch=0,
        grid=(n_tiles,),
        in_specs=[
            pl.BlockSpec((tb, D_IN), lambda i: (i, 0)),         # x tile (pipelined)
            pl.BlockSpec((D_IN, D_H), lambda i: (0, 0)),        # w1 (resident)
            pl.BlockSpec((1, D_H), lambda i: (0, 0)),           # b1
            pl.BlockSpec((D_H, D_H), lambda i: (0, 0)),         # w2 (resident)
            pl.BlockSpec((1, D_H), lambda i: (0, 0)),           # b2
            pl.BlockSpec((D_H, C_PAD), lambda i: (0, 0)),       # w3 padded (resident)
            pl.BlockSpec((1, C_PAD), lambda i: (0, 0)),         # b3 padded
        ],
        out_specs=pl.BlockSpec((tb, C_PAD), lambda i: (i, 0)),  # lane-dense out slab
    )

    return pl.pallas_call(
        _bnn_kernel,
        out_shape=jax.ShapeDtypeStruct((bp, C_PAD), jnp.float32),
        grid_spec=grid_spec,
        compiler_params=pltpu.CompilerParams(
            dimension_semantics=("parallel",),   # megacore batch sharding on v7x
        ),
        cost_estimate=pl.CostEstimate(
            flops=flops,
            transcendentals=transcendentals,
            bytes_accessed=bytes_accessed,
        ),
    )(x_pad, w1, b1, w2, b2, w3p, b3p)


# ----------------------------------------------------------------------------
# Parameter construction (deterministic, mirrors BayesianLinear.__init__)
# ----------------------------------------------------------------------------
def init_bayesian_linear(key, in_dim, out_dim):
    k_wmu, k_wrho, k_bmu, k_brho = jax.random.split(key, 4)
    # weight_mu ~ U(-0.2, 0.2); stored transposed as (in_dim, out_dim).
    w_mu = jax.random.uniform(k_wmu, (in_dim, out_dim), jnp.float32, -0.2, 0.2)
    w_rho = jax.random.uniform(k_wrho, (in_dim, out_dim), jnp.float32, -5.0, -4.0)
    b_mu = jax.random.uniform(k_bmu, (1, out_dim), jnp.float32, -0.2, 0.2)
    b_rho = jax.random.uniform(k_brho, (1, out_dim), jnp.float32, -5.0, -4.0)
    return dict(w_mu=w_mu, w_rho=w_rho, b_mu=b_mu, b_rho=b_rho)


def init_bayesian_network(key):
    k1, k2, k3 = jax.random.split(key, 3)
    return [
        init_bayesian_linear(k1, D_IN, D_H),
        init_bayesian_linear(k2, D_H, D_H),
        init_bayesian_linear(k3, D_H, N_CLASSES),
    ]


# ----------------------------------------------------------------------------
# Forward wrapper (glue in plain JAX; hot path is one Pallas kernel)
# ----------------------------------------------------------------------------
@partial(jax.jit, static_argnames=("sample",))
def bayesian_network_forward(params, x, sample=False, key=None):
    """Replicates BayesianNetwork.forward(x, sample).

    sample=False -> use posterior means (matches eval mode: `not training and
    not sample`). sample=True -> reparameterized weight sample
    mu + softplus(rho) * eps (done in the wrapper, fused by jit).
    """
    x2d = x.reshape(-1, D_IN).astype(jnp.float32)
    B = x2d.shape[0]

    ws, bs = [], []
    keys = jax.random.split(key, 2 * len(params)) if sample else None
    for i, p in enumerate(params):
        if sample:
            sw = jax.nn.softplus(p["w_rho"])   # numerically safe log1p(exp(.))
            sb = jax.nn.softplus(p["b_rho"])
            w = p["w_mu"] + sw * jax.random.normal(keys[2 * i], p["w_mu"].shape)
            b = p["b_mu"] + sb * jax.random.normal(keys[2 * i + 1], p["b_mu"].shape)
            # TODO(synk): log_prior / log_variational_posterior side-effect
            # scalars (ScaleMixtureGaussian / Gaussian.log_prob) not computed —
            # they are not part of the forward output tensor. In-kernel PRNG
            # fusion of the reparameterization (pltpu.prng_*) is a further
            # HBM-traffic win left for a future revision.
        else:
            w, b = p["w_mu"], p["b_mu"]
        ws.append(w)
        bs.append(b)

    # Batch tiling: TB rows per grid step (>= 8 sublanes, <= 256).
    TB = 256 if B >= 256 else max(8, 8 * ((B + 7) // 8))
    Bp = TB * ((B + TB - 1) // TB)
    x_pad = jnp.zeros((Bp, D_IN), jnp.bfloat16).at[:B].set(x2d.astype(jnp.bfloat16))

    # Lane-dense class padding: zero weight columns, -1e30 bias lanes so the
    # pad columns never affect max / sum(exp) in log_softmax.
    w3p = jnp.zeros((D_H, C_PAD), jnp.bfloat16).at[:, :N_CLASSES].set(
        ws[2].astype(jnp.bfloat16))
    b3p = jnp.full((1, C_PAD), -1e30, jnp.float32).at[:, :N_CLASSES].set(
        bs[2].astype(jnp.float32))

    out = _bnn_pallas_call(
        x_pad,
        ws[0].astype(jnp.bfloat16), bs[0].astype(jnp.float32),
        ws[1].astype(jnp.bfloat16), bs[1].astype(jnp.float32),
        w3p, b3p, TB)
    return out[:B, :N_CLASSES]


# ----------------------------------------------------------------------------
# Pure-JAX references for correctness checks
# ----------------------------------------------------------------------------
def reference_forward_f32(params, x):
    x2d = x.reshape(-1, D_IN).astype(jnp.float32)
    h = jax.nn.relu(x2d @ params[0]["w_mu"] + params[0]["b_mu"])
    h = jax.nn.relu(h @ params[1]["w_mu"] + params[1]["b_mu"])
    logits = h @ params[2]["w_mu"] + params[2]["b_mu"]
    return jax.nn.log_softmax(logits, axis=1)


def reference_forward_bf16(params, x):
    """Same numerics as the kernel: bf16 inputs, f32 MXU accumulation."""
    def mm(a, w):
        return jnp.dot(a.astype(jnp.bfloat16), w.astype(jnp.bfloat16),
                       preferred_element_type=jnp.float32)
    x2d = x.reshape(-1, D_IN).astype(jnp.float32)
    h = jax.nn.relu(mm(x2d, params[0]["w_mu"]) + params[0]["b_mu"])
    h = jax.nn.relu(mm(h, params[1]["w_mu"]) + params[1]["b_mu"])
    logits = mm(h, params[2]["w_mu"]) + params[2]["b_mu"]
    return jax.nn.log_softmax(logits, axis=1)


if __name__ == "__main__":
    root = jax.random.PRNGKey(0)
    k_params, k_x, k_sample = jax.random.split(root, 3)

    params = init_bayesian_network(k_params)

    # MNIST-like input: batch=2, NCHW [2, 1, 28, 28] (flattened to [2, 784]).
    x = jax.random.normal(k_x, (2, 1, 28, 28), jnp.float32)

    # Eval path (posterior means).
    out = bayesian_network_forward(params, x, sample=False)
    out = jax.block_until_ready(out)
    assert out.shape == (2, N_CLASSES), out.shape

    # Tight check against a reference with identical (bf16-in / f32-acc) numerics.
    ref_bf16 = reference_forward_bf16(params, x)
    assert jnp.allclose(out, ref_bf16, atol=2e-2, rtol=2e-2), "mismatch vs bf16 reference"

    # Loose sanity check against the exact-f32 module semantics (bf16 matmul noise).
    ref_f32 = reference_forward_f32(params, x)
    assert jnp.allclose(out, ref_f32, atol=5e-1), "mismatch vs f32 reference"
    assert jnp.allclose(jnp.sum(jnp.exp(out), axis=1), 1.0, atol=1e-3), "not a log-softmax"

    # Sampled (reparameterized) path: shape + finiteness.
    out_s = bayesian_network_forward(params, x, sample=True, key=k_sample)
    out_s = jax.block_until_ready(out_s)
    assert out_s.shape == (2, N_CLASSES)
    assert bool(jnp.all(jnp.isfinite(out_s)))

    print("KERNEL_OK")
</pallas_src>

<mosaic_0001>
module attributes {stable_mosaic.version = 11 : i64} {
  func.func @_bnn_kernel(%arg0: i32, %arg1: memref<8x784xbf16, #tpu.memory_space<vmem>>, %arg2: memref<784x400xbf16, #tpu.memory_space<vmem>>, %arg3: memref<1x400xf32, #tpu.memory_space<vmem>>, %arg4: memref<400x400xbf16, #tpu.memory_space<vmem>>, %arg5: memref<1x400xf32, #tpu.memory_space<vmem>>, %arg6: memref<400x128xbf16, #tpu.memory_space<vmem>>, %arg7: memref<1x128xf32, #tpu.memory_space<vmem>>, %arg8: memref<8x128xf32, #tpu.memory_space<vmem>>) attributes {dimension_semantics = [#tpu.dimension_semantics<parallel>], iteration_bounds = array<i64: 1>, scalar_prefetch = 0 : i64, scratch_operands = 0 : i64, tpu.core_type = #tpu.core_type<tc>, window_params = [{transform_indices = @transform_0, window_bounds = array<i64: 8, 784>}, {pipeline_mode = #tpu.pipeline_mode<synchronous>, transform_indices = @transform_1, window_bounds = array<i64: 784, 400>}, {pipeline_mode = #tpu.pipeline_mode<synchronous>, transform_indices = @transform_2, window_bounds = array<i64: 1, 400>}, {pipeline_mode = #tpu.pipeline_mode<synchronous>, transform_indices = @transform_3, window_bounds = array<i64: 400, 400>}, {pipeline_mode = #tpu.pipeline_mode<synchronous>, transform_indices = @transform_4, window_bounds = array<i64: 1, 400>}, {pipeline_mode = #tpu.pipeline_mode<synchronous>, transform_indices = @transform_5, window_bounds = array<i64: 400, 128>}, {pipeline_mode = #tpu.pipeline_mode<synchronous>, transform_indices = @transform_6, window_bounds = array<i64: 1, 128>}, {transform_indices = @transform_7, window_bounds = array<i64: 8, 128>}]} {
    %c0 = arith.constant 0 : index
    %c0_0 = arith.constant 0 : index
    %0 = vector.load %arg1[%c0, %c0_0] : memref<8x784xbf16, #tpu.memory_space<vmem>>, vector<8x784xbf16>
    %c0_1 = arith.constant 0 : index
    %c0_2 = arith.constant 0 : index
    %1 = vector.load %arg2[%c0_1, %c0_2] : memref<784x400xbf16, #tpu.memory_space<vmem>>, vector<784x400xbf16>
    %cst = arith.constant dense<0.000000e+00> : vector<8x400xf32>
    %2 = tpu.matmul %0, %1, %cst {dimension_numbers = #tpu.dot_dimension_numbers<[1], [0], [0], [1], [0, 0, 1, 1], [], []>} : vector<8x784xbf16>, vector<784x400xbf16>, vector<8x400xf32> -> vector<8x400xf32>
    %c0_3 = arith.constant 0 : index
    %c0_4 = arith.constant 0 : index
    %3 = vector.load %arg3[%c0_3, %c0_4] : memref<1x400xf32, #tpu.memory_space<vmem>>, vector<1x400xf32>
    %4 = vector.broadcast %3 : vector<1x400xf32> to vector<8x400xf32>
    %5 = arith.addf %2, %4 : vector<8x400xf32>
    %cst_5 = arith.constant 0.000000e+00 : f32
    %6 = vector.broadcast %cst_5 : f32 to vector<8x400xf32>
    %7 = arith.maximumf %5, %6 : vector<8x400xf32>
    %8 = arith.truncf %7 : vector<8x400xf32> to vector<8x400xbf16>
    %c0_6 = arith.constant 0 : index
    %c0_7 = arith.constant 0 : index
    %9 = vector.load %arg4[%c0_6, %c0_7] : memref<400x400xbf16, #tpu.memory_space<vmem>>, vector<400x400xbf16>
    %cst_8 = arith.constant dense<0.000000e+00> : vector<8x400xf32>
    %10 = tpu.matmul %8, %9, %cst_8 {dimension_numbers = #tpu.dot_dimension_numbers<[1], [0], [0], [1], [0, 0, 1, 1], [], []>} : vector<8x400xbf16>, vector<400x400xbf16>, vector<8x400xf32> -> vector<8x400xf32>
    %c0_9 = arith.constant 0 : index
    %c0_10 = arith.constant 0 : index
    %11 = vector.load %arg5[%c0_9, %c0_10] : memref<1x400xf32, #tpu.memory_space<vmem>>, vector<1x400xf32>
    %12 = vector.broadcast %11 : vector<1x400xf32> to vector<8x400xf32>
    %13 = arith.addf %10, %12 : vector<8x400xf32>
    %cst_11 = arith.constant 0.000000e+00 : f32
    %14 = vector.broadcast %cst_11 : f32 to vector<8x400xf32>
    %15 = arith.maximumf %13, %14 : vector<8x400xf32>
    %16 = arith.truncf %15 : vector<8x400xf32> to vector<8x400xbf16>
    %c0_12 = arith.constant 0 : index
    %c0_13 = arith.constant 0 : index
    %17 = vector.load %arg6[%c0_12, %c0_13] : memref<400x128xbf16, #tpu.memory_space<vmem>>, vector<400x128xbf16>
    %cst_14 = arith.constant dense<0.000000e+00> : vector<8x128xf32>
    %18 = tpu.matmul %16, %17, %cst_14 {dimension_numbers = #tpu.dot_dimension_numbers<[1], [0], [0], [1], [0, 0, 1, 1], [], []>} : vector<8x400xbf16>, vector<400x128xbf16>, vector<8x128xf32> -> vector<8x128xf32>
    %c0_15 = arith.constant 0 : index
    %c0_16 = arith.constant 0 : index
    %19 = vector.load %arg7[%c0_15, %c0_16] : memref<1x128xf32, #tpu.memory_space<vmem>>, vector<1x128xf32>
    %20 = vector.broadcast %19 : vector<1x128xf32> to vector<8x128xf32>
    %21 = arith.addf %18, %20 : vector<8x128xf32>
    %cst_17 = arith.constant dense<0xFF800000> : vector<8xf32>
    %22 = vector.multi_reduction <maximumf>, %21, %cst_17 [1] : vector<8x128xf32> to vector<8xf32>
    %23 = vector.shape_cast %22 : vector<8xf32> to vector<8x1xf32>
    %24 = vector.broadcast %23 : vector<8x1xf32> to vector<8x128xf32>
    %25 = arith.subf %21, %24 : vector<8x128xf32>
    %26 = math.exp %25 : vector<8x128xf32>
    %cst_18 = arith.constant dense<0.000000e+00> : vector<8xf32>
    %27 = vector.multi_reduction <add>, %26, %cst_18 [1] : vector<8x128xf32> to vector<8xf32>
    %28 = vector.shape_cast %27 : vector<8xf32> to vector<8x1xf32>
    %29 = math.log %28 : vector<8x1xf32>
    %30 = vector.broadcast %29 : vector<8x1xf32> to vector<8x128xf32>
    %31 = arith.subf %25, %30 : vector<8x128xf32>
    %c0_19 = arith.constant 0 : index
    %c0_20 = arith.constant 0 : index
    %32 = vector.load %arg8[%c0_19, %c0_20] : memref<8x128xf32, #tpu.memory_space<vmem>>, vector<8x128xf32>
    tpu.vector_store %arg8[%c0_19, %c0_20], %31 {strides = array<i32>} : memref<8x128xf32, #tpu.memory_space<vmem>>, vector<8x128xf32>,
    return
  }
  func.func @transform_0(%arg0: i32) -> (i32, i32) {
    %c0_i32 = arith.constant 0 : i32
    %c0_i32_0 = arith.constant 0 : i32
    return %arg0, %c0_i32 : i32, i32
  }
  func.func @transform_1(%arg0: i32) -> (i32, i32) {
    %c0_i32 = arith.constant 0 : i32
    %c0_i32_0 = arith.constant 0 : i32
    %c0_i32_1 = arith.constant 0 : i32
    return %c0_i32, %c0_i32_0 : i32, i32
  }
  func.func @transform_2(%arg0: i32) -> (i32, i32) {
    %c0_i32 = arith.constant 0 : i32
    %c0_i32_0 = arith.constant 0 : i32
    %c0_i32_1 = arith.constant 0 : i32
    return %c0_i32, %c0_i32_0 : i32, i32
  }
  func.func @transform_3(%arg0: i32) -> (i32, i32) {
    %c0_i32 = arith.constant 0 : i32
    %c0_i32_0 = arith.constant 0 : i32
    %c0_i32_1 = arith.constant 0 : i32
    return %c0_i32, %c0_i32_0 : i32, i32
  }
  func.func @transform_4(%arg0: i32) -> (i32, i32) {
    %c0_i32 = arith.constant 0 : i32
    %c0_i32_0 = arith.constant 0 : i32
    %c0_i32_1 = arith.constant 0 : i32
    return %c0_i32, %c0_i32_0 : i32, i32
  }
  func.func @transform_5(%arg0: i32) -> (i32, i32) {
    %c0_i32 = arith.constant 0 : i32
    %c0_i32_0 = arith.constant 0 : i32
    %c0_i32_1 = arith.constant 0 : i32
    return %c0_i32, %c0_i32_0 : i32, i32
  }
  func.func @transform_6(%arg0: i32) -> (i32, i32) {
    %c0_i32 = arith.constant 0 : i32
    %c0_i32_0 = arith.constant 0 : i32
    %c0_i32_1 = arith.constant 0 : i32
    return %c0_i32, %c0_i32_0 : i32, i32
  }
  func.func @transform_7(%arg0: i32) -> (i32, i32) {
    %c0_i32 = arith.constant 0 : i32
    %c0_i32_0 = arith.constant 0 : i32
    return %arg0, %c0_i32 : i32, i32
  }
}

</mosaic_0001>

<bundles_post_ra>
// kernel: bayesian_network_forward.1
= control target key start
LH: loop header
LB: loop body
LE: loop exit
PB: predicated region body
PF: predicated region fallthrough
CT: control target
= control target key end

     0   :  { %vm1253_vm0 = vcmask 130048   ;;  %s4659_s1 = inlined_call_operand.vmem [shape: bf16[784,400], index: 1, kind: input, shape index: {}]   ;;  %s4660_s0 = inlined_call_operand.vmem [shape: bf16[8,784], index: 0, kind: input, shape index: {}]   ;;  %s4661_s3 = inlined_call_operand.vmem [shape: bf16[400,400], index: 3, kind: input, shape index: {}]   ;;  %s4662_s5 = inlined_call_operand.vmem [shape: bf16[400,128], index: 5, kind: input, shape index: {}]   ;;  %s4663_s2 = inlined_call_operand.vmem [shape: f32[1,400], index: 2, kind: input, shape index: {}]   ;;  %s4664_s4 = inlined_call_operand.vmem [shape: f32[1,400], index: 4, kind: input, shape index: {}]   ;;  %s4665_s6 = inlined_call_operand.vmem [shape: f32[1,128], index: 6, kind: input, shape index: {}]   ;;  %s4666_s7 = inlined_call_operand.vmem [shape: f32[8,128], index: 7, kind: output, shape index: {}]  }
   0x1   :  { %v3092_v0 = vld [vmem:[%s4659_s1 + $0x4] ss:$16 sps:$4 sm:$0xff]   ;;  %v3094_v1 = vld [vmem:[%s4659_s1 + $0xc] ss:$16 sps:$4 sm:$0xff]   ;;  %v3096_v2 = vld [vmem:[%s4659_s1] ss:$16 sps:$4 sm:$0xff]  }
   0x2   :  { %1257 = vmatprep.subr.bf16.mxu0 %v3092_v0  ;;  %v3097_v3 = vld [vmem:[%s4659_s1 + $0x8] ss:$16 sps:$4 sm:$0xff]   ;;  %1421 = vmatprep.subr.bf16.mxu1 %v3094_v1  ;;  %v3098_v4 = vld [vmem:[%s4659_s1 + $0x24] ss:$16 sps:$4 sm:$0xff]   ;;  %v3100_v5 = vld [vmem:[%s4659_s1 + $0x2c] ss:$16 sps:$4 sm:$0xff]  }
   0x3   :  { %1258 = vmatpush1.bf16.msra.mxu0 %v3096_v2  ;;  %1422 = vmatpush1.bf16.msra.mxu1 %v3097_v3  ;;  %v3102_v6 = vld [vmem:[%s4659_s1 + $0x20] ss:$16 sps:$4 sm:$0xff]   ;;  %v3103_v7 = vld [vmem:[%s4659_s1 + $0x28] ss:$16 sps:$4 sm:$0xff]   ;;  %v3104_v8 = vld [vmem:[%s4659_s1 + $0x44] ss:$16 sps:$4 sm:$0xff]  }
   0x4   :  { %1259 = vmatprep.subr.bf16.mxu0 %v3098_v4  ;;  %1423 = vmatprep.subr.bf16.mxu1 %v3100_v5  ;;  %v3106_v9 = vld [vmem:[%s4659_s1 + $0x4c] ss:$16 sps:$4 sm:$0xff]   ;;  %v3108_v10 = vld [vmem:[%s4659_s1 + $0x40] ss:$16 sps:$4 sm:$0xff]   ;;  %v3109_v11 = vld [vmem:[%s4659_s1 + $0x48] ss:$16 sps:$4 sm:$0xff]  }
   0x5   :  { %v3110_v12 = vld [vmem:[%s4659_s1 + $0x64] ss:$16 sps:$4 sm:$0xff]   ;;  %v3112_v13 = vld [vmem:[%s4659_s1 + $0x6c] ss:$16 sps:$4 sm:$0xff]   ;;  %v3114_v14 = vld [vmem:[%s4659_s1 + $0x60] ss:$16 sps:$4 sm:$0xff]  }
   0x6   :  { %v3115_v15 = vld [vmem:[%s4659_s1 + $0x68] ss:$16 sps:$4 sm:$0xff]   ;;  %v3116_v16 = vld [vmem:[%s4659_s1 + $0x84] ss:$16 sps:$4 sm:$0xff]   ;;  %v3118_v17 = vld [vmem:[%s4659_s1 + $0x8c] ss:$16 sps:$4 sm:$0xff]  }
   0x7   :  { %1260 = vmatpush1.bf16.msra.mxu0 %v3102_v6  ;;  %1424 = vmatpush1.bf16.msra.mxu1 %v3103_v7  ;;  %v3120_v18 = vld [vmem:[%s4659_s1 + $0x80] ss:$16 sps:$4 sm:$0xff]   ;;  %v3121_v19 = vld [vmem:[%s4659_s1 + $0x88] ss:$16 sps:$4 sm:$0xff]   ;;  %v3122_v20 = vld [vmem:[%s4659_s1 + $0xa4] ss:$16 sps:$4 sm:$0xff]  }
   0x8   :  { %1261 = vmatprep.subr.bf16.mxu0 %v3104_v8  ;;  %1425 = vmatprep.subr.bf16.mxu1 %v3106_v9  ;;  %v3124_v21 = vld [vmem:[%s4659_s1 + $0xac] ss:$16 sps:$4 sm:$0xff]   ;;  %v3126_v22 = vld [vmem:[%s4659_s1 + $0xa0] ss:$16 sps:$4 sm:$0xff]   ;;  %v3127_v23 = vld [vmem:[%s4659_s1 + $0xa8] ss:$16 sps:$4 sm:$0xff]  }
   0x9   :  { %v3128_v24 = vld [vmem:[%s4659_s1 + $0xc4] ss:$16 sps:$4 sm:$0xff]   ;;  %v3130_v25 = vld [vmem:[%s4659_s1 + $0xcc] ss:$16 sps:$4 sm:$0xff]   ;;  %v3132_v26 = vld [vmem:[%s4659_s1 + $0xc0] ss:$16 sps:$4 sm:$0xff]  }
   0xa   :  { %v3133_v27 = vld [vmem:[%s4659_s1 + $0xc8] ss:$16 sps:$4 sm:$0xff]   ;;  %v3134_v28 = vld [vmem:[%s4659_s1 + $0xe4] ss:$16 sps:$4 sm:$0xff]   ;;  %v3136_v29 = vld [vmem:[%s4659_s1 + $0xec] ss:$16 sps:$4 sm:$0xff]  }
   0xb   :  { %1262 = vmatpush1.bf16.msra.mxu0 %v3108_v10  ;;  %1426 = vmatpush1.bf16.msra.mxu1 %v3109_v11  ;;  %v3138_v30 = vld [vmem:[%s4659_s1 + $0xe0] ss:$16 sps:$4 sm:$0xff]   ;;  %v3139_v31 = vld [vmem:[%s4659_s1 + $0xe8] ss:$16 sps:$4 sm:$0xff]   ;;  %v3140_v32 = vld [vmem:[%s4659_s1 + $0x104] ss:$16 sps:$4 sm:$0xff]  }
   0xc   :  { %1263 = vmatprep.subr.bf16.mxu0 %v3110_v12  ;;  %1427 = vmatprep.subr.bf16.mxu1 %v3112_v13  ;;  %v3142_v33 = vld [vmem:[%s4659_s1 + $0x10c] ss:$16 sps:$4 sm:$0xff]   ;;  %v3144_v34 = vld [vmem:[%s4659_s1 + $0x100] ss:$16 sps:$4 sm:$0xff]   ;;  %v3145_v35 = vld [vmem:[%s4659_s1 + $0x108] ss:$16 sps:$4 sm:$0xff]  }
   0xd   :  { %v3146_v36 = vld [vmem:[%s4659_s1 + $0x124] ss:$16 sps:$4 sm:$0xff]   ;;  %v3148_v37 = vld [vmem:[%s4659_s1 + $0x12c] ss:$16 sps:$4 sm:$0xff]   ;;  %v3150_v38 = vld [vmem:[%s4659_s1 + $0x120] ss:$16 sps:$4 sm:$0xff]  }
   0xe   :  { %v3151_v39 = vld [vmem:[%s4659_s1 + $0x128] ss:$16 sps:$4 sm:$0xff]   ;;  %v3152_v40 = vld [vmem:[%s4659_s1 + $0x144] ss:$16 sps:$4 sm:$0xff]   ;;  %v3154_v41 = vld [vmem:[%s4659_s1 + $0x14c] ss:$16 sps:$4 sm:$0xff]  }
   0xf   :  { %1264 = vmatpush1.bf16.msra.mxu0 %v3114_v14  ;;  %1428 = vmatpush1.bf16.msra.mxu1 %v3115_v15  ;;  %v3156_v42 = vld [vmem:[%s4659_s1 + $0x140] ss:$16 sps:$4 sm:$0xff]   ;;  %v3157_v43 = vld [vmem:[%s4659_s1 + $0x148] ss:$16 sps:$4 sm:$0xff]   ;;  %v3158_v44 = vld [vmem:[%s4659_s1 + $0x164] ss:$16 sps:$4 sm:$0xff]  }
  0x10   :  { %1265 = vmatprep.subr.bf16.mxu0 %v3116_v16  ;;  %1429 = vmatprep.subr.bf16.mxu1 %v3118_v17  ;;  %v3160_v45 = vld [vmem:[%s4659_s1 + $0x16c] ss:$16 sps:$4 sm:$0xff]   ;;  %v27_v46 = vld [vmem:[%s4660_s0] sm:$0xff]  ;;  %v3163_v49 = vld [vmem:[%s4659_s1 + $0x168] ss:$16 sps:$4 sm:$0xff]  }
  0x11   :  { %v3162_v47 = vld [vmem:[%s4659_s1 + $0x160] ss:$16 sps:$4 sm:$0xff]   ;;  %v2696_v48 = vcombine.high %v27_v46, %v27_v46  ;;  %v3164_v50 = vld [vmem:[%s4659_s1 + $0x184] ss:$16 sps:$4 sm:$0xff]   ;;  %v3166_v51 = vld [vmem:[%s4659_s1 + $0x18c] ss:$16 sps:$4 sm:$0xff]   ;;  %v2695_v4 = vcombine.low %v27_v46, %v27_v46 }
  0x12   :  { %v3168_v52 = vld [vmem:[%s4659_s1 + $0x180] ss:$16 sps:$4 sm:$0xff]   ;;  %v3169_v53 = vld [vmem:[%s4659_s1 + $0x188] ss:$16 sps:$4 sm:$0xff]   ;;  %v3170_v54 = vld [vmem:[%s4659_s1 + $0x1a4] ss:$16 sps:$4 sm:$0xff]  }
  0x13   :  { %1266 = vmatpush1.bf16.msra.mxu0 %v3120_v18  ;;  %1430 = vmatpush1.bf16.msra.mxu1 %v3121_v19  ;;  %v3172_v55 = vld [vmem:[%s4659_s1 + $0x1ac] ss:$16 sps:$4 sm:$0xff]   ;;  %v3174_v56 = vld [vmem:[%s4659_s1 + $0x1a0] ss:$16 sps:$4 sm:$0xff]   ;;  %v3175_v57 = vld [vmem:[%s4659_s1 + $0x1a8] ss:$16 sps:$4 sm:$0xff]  }
  0x14   :  { %1267 = vmatprep.subr.bf16.mxu0 %v3122_v20  ;;  %1431 = vmatprep.subr.bf16.mxu1 %v3124_v21  ;;  %v3176_v58 = vld [vmem:[%s4659_s1 + $0x1c4] ss:$16 sps:$4 sm:$0xff]   ;;  %v3178_v59 = vld [vmem:[%s4659_s1 + $0x1cc] ss:$16 sps:$4 sm:$0xff]   ;;  %v3180_v60 = vld [vmem:[%s4659_s1 + $0x1c0] ss:$16 sps:$4 sm:$0xff]  }
  0x15   :  { %1289 = vmatprep.mubr.bf16.mxu0 %v2696_v48  ;;  %1453 = vmatprep.mubr.bf16.mxu1 %v2696_v48  ;;  %v3181_v61 = vld [vmem:[%s4659_s1 + $0x1c8] ss:$16 sps:$4 sm:$0xff]   ;;  %v3182_v62 = vld [vmem:[%s4659_s1 + $0x1e4] ss:$16 sps:$4 sm:$0xff]   ;;  %v3184_v63 = vld [vmem:[%s4659_s1 + $0x1ec] ss:$16 sps:$4 sm:$0xff]  }
  0x16   :  { %v3186_v0 = vld [vmem:[%s4659_s1 + $0x1e0] ss:$16 sps:$4 sm:$0xff]   ;;  %v3187_v1 = vld [vmem:[%s4659_s1 + $0x1e8] ss:$16 sps:$4 sm:$0xff]   ;;  %v3193_v2 = vld [vmem:[%s4659_s1 + $0x204] ss:$16 sps:$4 sm:$0xff]  }
  0x17   :  { %1268 = vmatpush1.bf16.msra.mxu0 %v3126_v22  ;;  %1432 = vmatpush1.bf16.msra.mxu1 %v3127_v23  ;;  %v3196_v3 = vld [vmem:[%s4659_s1 + $0x20c] ss:$16 sps:$4 sm:$0xff]   ;;  %v3191_v5 = vld [vmem:[%s4659_s1 + $0x200] ss:$16 sps:$4 sm:$0xff]   ;;  %v3194_v6 = vld [vmem:[%s4659_s1 + $0x208] ss:$16 sps:$4 sm:$0xff]  }
  0x18   :  { %1269 = vmatprep.subr.bf16.mxu0 %v3128_v24  ;;  %1433 = vmatprep.subr.bf16.mxu1 %v3130_v25  ;;  %v3199_v7 = vld [vmem:[%s4659_s1 + $0x224] ss:$16 sps:$4 sm:$0xff]   ;;  %v3202_v8 = vld [vmem:[%s4659_s1 + $0x22c] ss:$16 sps:$4 sm:$0xff]   ;;  %v3197_v9 = vld [vmem:[%s4659_s1 + $0x220] ss:$16 sps:$4 sm:$0xff]  }
  0x19   :  { %v3200_v10 = vld [vmem:[%s4659_s1 + $0x228] ss:$16 sps:$4 sm:$0xff]   ;;  %v3205_v11 = vld [vmem:[%s4659_s1 + $0x244] ss:$16 sps:$4 sm:$0xff]   ;;  %v3208_v12 = vld [vmem:[%s4659_s1 + $0x24c] ss:$16 sps:$4 sm:$0xff]  }
  0x1a   :  { %v3203_v13 = vld [vmem:[%s4659_s1 + $0x240] ss:$16 sps:$4 sm:$0xff]   ;;  %v3206_v14 = vld [vmem:[%s4659_s1 + $0x248] ss:$16 sps:$4 sm:$0xff]   ;;  %v3211_v15 = vld [vmem:[%s4659_s1 + $0x264] ss:$16 sps:$4 sm:$0xff]  }
  0x1b   :  { %1270 = vmatpush1.bf16.msra.mxu0 %v3132_v26  ;;  %1434 = vmatpush1.bf16.msra.mxu1 %v3133_v27  ;;  %v3214_v16 = vld [vmem:[%s4659_s1 + $0x26c] ss:$16 sps:$4 sm:$0xff]   ;;  %v3209_v17 = vld [vmem:[%s4659_s1 + $0x260] ss:$16 sps:$4 sm:$0xff]   ;;  %v3212_v18 = vld [vmem:[%s4659_s1 + $0x268] ss:$16 sps:$4 sm:$0xff]  }
  0x1c   :  { %1271 = vmatprep.subr.bf16.mxu0 %v3134_v28  ;;  %1435 = vmatprep.subr.bf16.mxu1 %v3136_v29  ;;  %v3217_v19 = vld [vmem:[%s4659_s1 + $0x284] ss:$16 sps:$4 sm:$0xff]   ;;  %v3220_v20 = vld [vmem:[%s4659_s1 + $0x28c] ss:$16 sps:$4 sm:$0xff]   ;;  %v3215_v21 = vld [vmem:[%s4659_s1 + $0x280] ss:$16 sps:$4 sm:$0xff]  }
  0x1d   :  { %v3218_v22 = vld [vmem:[%s4659_s1 + $0x288] ss:$16 sps:$4 sm:$0xff]   ;;  %v3223_v23 = vld [vmem:[%s4659_s1 + $0x2a4] ss:$16 sps:$4 sm:$0xff]   ;;  %v3226_v24 = vld [vmem:[%s4659_s1 + $0x2ac] ss:$16 sps:$4 sm:$0xff]  }
  0x1e   :  { %v3221_v25 = vld [vmem:[%s4659_s1 + $0x2a0] ss:$16 sps:$4 sm:$0xff]   ;;  %v3224_v26 = vld [vmem:[%s4659_s1 + $0x2a8] ss:$16 sps:$4 sm:$0xff]   ;;  %v3229_v27 = vld [vmem:[%s4659_s1 + $0x2c4] ss:$16 sps:$4 sm:$0xff]  }
  0x1f   :  { %1272 = vmatpush1.bf16.msra.mxu0 %v3138_v30  ;;  %1436 = vmatpush1.bf16.msra.mxu1 %v3139_v31  ;;  %v3232_v28 = vld [vmem:[%s4659_s1 + $0x2cc] ss:$16 sps:$4 sm:$0xff]   ;;  %v3227_v30 = vld [vmem:[%s4659_s1 + $0x2c0] ss:$16 sps:$4 sm:$0xff]   ;;  %v3230_v31 = vld [vmem:[%s4659_s1 + $0x2c8] ss:$16 sps:$4 sm:$0xff]  }
  0x20   :  { %1273 = vmatprep.subr.bf16.mxu0 %v3140_v32  ;;  %1437 = vmatprep.subr.bf16.mxu1 %v3142_v33  ;;  %v3889_v29 = vld [vmem:[%s4660_s0 + $0x8] sm:$0xff]  ;;  %v3235_v33 = vld [vmem:[%s4659_s1 + $0x2e4] ss:$16 sps:$4 sm:$0xff]  }
  0x21   :  { %v2698_v32 = vcombine.high %v3889_v29, %v3889_v29  ;;  %v3256_v46 = vld [vmem:[%s4659_s1 + $0x34c] ss:$16 sps:$4 sm:$0xff]   ;;  %v3254_v48 = vld [vmem:[%s4659_s1 + $0x348] ss:$16 sps:$4 sm:$0xff]  }
  0x23   :  { %1274 = vmatpush1.bf16.msra.mxu0 %v3144_v34  ;;  %1438 = vmatpush1.bf16.msra.mxu1 %v3145_v35  ;;  %v3238_v34 = vld [vmem:[%s4659_s1 + $0x2ec] ss:$16 sps:$4 sm:$0xff]   ;;  %v3233_v35 = vld [vmem:[%s4659_s1 + $0x2e0] ss:$16 sps:$4 sm:$0xff]  }
  0x24   :  { %1275 = vmatprep.subr.bf16.mxu0 %v3146_v36  ;;  %1439 = vmatprep.subr.bf16.mxu1 %v3148_v37  ;;  %v3236_v36 = vld [vmem:[%s4659_s1 + $0x2e8] ss:$16 sps:$4 sm:$0xff]   ;;  %v3241_v37 = vld [vmem:[%s4659_s1 + $0x304] ss:$16 sps:$4 sm:$0xff]  }
  0x27   :  { %1276 = vmatpush1.bf16.msra.mxu0 %v3150_v38  ;;  %1440 = vmatpush1.bf16.msra.mxu1 %v3151_v39  ;;  %v3244_v38 = vld [vmem:[%s4659_s1 + $0x30c] ss:$16 sps:$4 sm:$0xff]   ;;  %v3239_v39 = vld [vmem:[%s4659_s1 + $0x300] ss:$16 sps:$4 sm:$0xff]  }
  0x28   :  { %1277 = vmatprep.subr.bf16.mxu0 %v3152_v40  ;;  %1441 = vmatprep.subr.bf16.mxu1 %v3154_v41  ;;  %v3242_v40 = vld [vmem:[%s4659_s1 + $0x308] ss:$16 sps:$4 sm:$0xff]   ;;  %v3247_v41 = vld [vmem:[%s4659_s1 + $0x324] ss:$16 sps:$4 sm:$0xff]  }
  0x2b   :  { %1278 = vmatpush1.bf16.msra.mxu0 %v3156_v42  ;;  %1442 = vmatpush1.bf16.msra.mxu1 %v3157_v43  ;;  %v3250_v42 = vld [vmem:[%s4659_s1 + $0x32c] ss:$16 sps:$4 sm:$0xff]   ;;  %v3245_v43 = vld [vmem:[%s4659_s1 + $0x320] ss:$16 sps:$4 sm:$0xff]  }
  0x2c   :  { %1279 = vmatprep.subr.bf16.mxu0 %v3158_v44  ;;  %1443 = vmatprep.subr.bf16.mxu1 %v3160_v45  ;;  %v3248_v44 = vld [vmem:[%s4659_s1 + $0x328] ss:$16 sps:$4 sm:$0xff]   ;;  %v3253_v45 = vld [vmem:[%s4659_s1 + $0x344] ss:$16 sps:$4 sm:$0xff]  }
  0x2f   :  { %1280 = vmatpush1.bf16.msra.mxu0 %v3162_v47  ;;  %1444 = vmatpush1.bf16.msra.mxu1 %v3163_v49  ;;  %v3251_v47 = vld [vmem:[%s4659_s1 + $0x340] ss:$16 sps:$4 sm:$0xff]   ;;  %v3259_v49 = vld [vmem:[%s4659_s1 + $0x364] ss:$16 sps:$4 sm:$0xff]  }
  0x30   :  { %1281 = vmatprep.subr.bf16.mxu0 %v3164_v50  ;;  %1445 = vmatprep.subr.bf16.mxu1 %v3166_v51  ;;  %v3262_v50 = vld [vmem:[%s4659_s1 + $0x36c] ss:$16 sps:$4 sm:$0xff]   ;;  %v3257_v51 = vld [vmem:[%s4659_s1 + $0x360] ss:$16 sps:$4 sm:$0xff]  }
  0x33   :  { %1282 = vmatpush1.bf16.msra.mxu0 %v3168_v52  ;;  %1446 = vmatpush1.bf16.msra.mxu1 %v3169_v53  ;;  %v3260_v52 = vld [vmem:[%s4659_s1 + $0x368] ss:$16 sps:$4 sm:$0xff]   ;;  %v3265_v53 = vld [vmem:[%s4659_s1 + $0x384] ss:$16 sps:$4 sm:$0xff]  }
  0x34   :  { %1283 = vmatprep.subr.bf16.mxu0 %v3170_v54  ;;  %1447 = vmatprep.subr.bf16.mxu1 %v3172_v55  ;;  %v3268_v54 = vld [vmem:[%s4659_s1 + $0x38c] ss:$16 sps:$4 sm:$0xff]   ;;  %v3263_v55 = vld [vmem:[%s4659_s1 + $0x380] ss:$16 sps:$4 sm:$0xff]  }
  0x37   :  { %1284 = vmatpush1.bf16.msra.mxu0 %v3174_v56  ;;  %1448 = vmatpush1.bf16.msra.mxu1 %v3175_v57  ;;  %v3266_v56 = vld [vmem:[%s4659_s1 + $0x388] ss:$16 sps:$4 sm:$0xff]   ;;  %v3271_v57 = vld [vmem:[%s4659_s1 + $0x3a4] ss:$16 sps:$4 sm:$0xff]  }
  0x38   :  { %1285 = vmatprep.subr.bf16.mxu0 %v3176_v58  ;;  %1449 = vmatprep.subr.bf16.mxu1 %v3178_v59  ;;  %v3274_v58 = vld [vmem:[%s4659_s1 + $0x3ac] ss:$16 sps:$4 sm:$0xff]   ;;  %v3269_v59 = vld [vmem:[%s4659_s1 + $0x3a0] ss:$16 sps:$4 sm:$0xff]  }
  0x3b   :  { %1286 = vmatpush1.bf16.msra.mxu0 %v3180_v60  ;;  %1450 = vmatpush1.bf16.msra.mxu1 %v3181_v61  ;;  %v3272_v60 = vld [vmem:[%s4659_s1 + $0x3a8] ss:$16 sps:$4 sm:$0xff]   ;;  %v3277_v61 = vld [vmem:[%s4659_s1 + $0x3c4] ss:$16 sps:$4 sm:$0xff]  }
  0x3c   :  { %1287 = vmatprep.subr.bf16.mxu0 %v3182_v62  ;;  %1451 = vmatprep.subr.bf16.mxu1 %v3184_v63  ;;  %v3280_v62 = vld [vmem:[%s4659_s1 + $0x3cc] ss:$16 sps:$4 sm:$0xff]   ;;  %v3275_v63 = vld [vmem:[%s4659_s1 + $0x3c0] ss:$16 sps:$4 sm:$0xff]  }
  0x3f   :  { %1288 = vmatpush1.bf16.msra.mxu0 %v3186_v0  ;;  %1452 = vmatpush1.bf16.msra.mxu1 %v3187_v1  ;;  %v3278_v0 = vld [vmem:[%s4659_s1 + $0x3c8] ss:$16 sps:$4 sm:$0xff]   ;;  %v3283_v1 = vld [vmem:[%s4659_s1 + $0x3e4] ss:$16 sps:$4 sm:$0xff]  }
  0x40   :  { %1298 = vmatprep.subr.bf16.mxu0 %v3193_v2  ;;  %1462 = vmatprep.subr.bf16.mxu1 %v3196_v3  ;;  %v3286_v2 = vld [vmem:[%s4659_s1 + $0x3ec] ss:$16 sps:$4 sm:$0xff]   ;;  %v3281_v3 = vld [vmem:[%s4659_s1 + $0x3e0] ss:$16 sps:$4 sm:$0xff]  }
  0x42   :  { %1290 = vmatmul.mubr.bf16.vlgmr.msra.gmra.mrb[0].mxu0 %v2695_v4  ;;  %1454 = vmatmul.mubr.bf16.vlgmr.msra.gmra.mrb[0].mxu1 %v2695_v4  ;;  %v3284_v4 = vld [vmem:[%s4659_s1 + $0x3e8] ss:$16 sps:$4 sm:$0xff]  }
  0x43   :  { %1299 = vmatpush1.bf16.msra.mxu0 %v3191_v5  ;;  %1463 = vmatpush1.bf16.msra.mxu1 %v3194_v6  ;;  %v3291_v5 = vld [vmem:[%s4659_s1 + $0x404] ss:$16 sps:$4 sm:$0xff]   ;;  %v3294_v6 = vld [vmem:[%s4659_s1 + $0x40c] ss:$16 sps:$4 sm:$0xff]  }
  0x44   :  { %1300 = vmatprep.subr.bf16.mxu0 %v3199_v7  ;;  %1464 = vmatprep.subr.bf16.mxu1 %v3202_v8  ;;  %v2697_v7 = vcombine.low %v3889_v29, %v3889_v29  ;;  %v3289_v8 = vld [vmem:[%s4659_s1 + $0x400] ss:$16 sps:$4 sm:$0xff]   ;;  %v3324_v29 = vld [vmem:[%s4659_s1 + $0x4ac] ss:$16 sps:$4 sm:$0xff]  }
  0x45   :  { %1330 = vmatprep.mubr.bf16.mxu0 %v2698_v32  ;;  %1494 = vmatprep.mubr.bf16.mxu1 %v2698_v32  ;;  %v3327_v32 = vld [vmem:[%s4659_s1 + $0x4c4] ss:$16 sps:$4 sm:$0xff]  }
  0x47   :  { %1301 = vmatpush1.bf16.msra.mxu0 %v3197_v9  ;;  %1465 = vmatpush1.bf16.msra.mxu1 %v3200_v10  ;;  %v3292_v9 = vld [vmem:[%s4659_s1 + $0x408] ss:$16 sps:$4 sm:$0xff]   ;;  %v3297_v10 = vld [vmem:[%s4659_s1 + $0x424] ss:$16 sps:$4 sm:$0xff]  }
  0x48   :  { %1302 = vmatprep.subr.bf16.mxu0 %v3205_v11  ;;  %1466 = vmatprep.subr.bf16.mxu1 %v3208_v12  ;;  %v3300_v11 = vld [vmem:[%s4659_s1 + $0x42c] ss:$16 sps:$4 sm:$0xff]   ;;  %v4030_v12 = vld [vmem:[%s4660_s0 + $0x10] sm:$0xff] }
  0x4b   :  { %1303 = vmatpush1.bf16.msra.mxu0 %v3203_v13  ;;  %1467 = vmatpush1.bf16.msra.mxu1 %v3206_v14  ;;  %v2700_v13 = vcombine.high %v4030_v12, %v4030_v12  ;;  %v3295_v14 = vld [vmem:[%s4659_s1 + $0x420] ss:$16 sps:$4 sm:$0xff]  }
  0x4c   :  { %1304 = vmatprep.subr.bf16.mxu0 %v3211_v15  ;;  %1468 = vmatprep.subr.bf16.mxu1 %v3214_v16  ;;  %v3298_v15 = vld [vmem:[%s4659_s1 + $0x428] ss:$16 sps:$4 sm:$0xff]   ;;  %v3303_v16 = vld [vmem:[%s4659_s1 + $0x444] ss:$16 sps:$4 sm:$0xff]  }
  0x4f   :  { %1305 = vmatpush1.bf16.msra.mxu0 %v3209_v17  ;;  %1469 = vmatpush1.bf16.msra.mxu1 %v3212_v18  ;;  %v3306_v17 = vld [vmem:[%s4659_s1 + $0x44c] ss:$16 sps:$4 sm:$0xff]   ;;  %v3301_v18 = vld [vmem:[%s4659_s1 + $0x440] ss:$16 sps:$4 sm:$0xff]  }
  0x50   :  { %1306 = vmatprep.subr.bf16.mxu0 %v3217_v19  ;;  %1470 = vmatprep.subr.bf16.mxu1 %v3220_v20  ;;  %v3304_v19 = vld [vmem:[%s4659_s1 + $0x448] ss:$16 sps:$4 sm:$0xff]   ;;  %v3309_v20 = vld [vmem:[%s4659_s1 + $0x464] ss:$16 sps:$4 sm:$0xff]  }
  0x53   :  { %1307 = vmatpush1.bf16.msra.mxu0 %v3215_v21  ;;  %1471 = vmatpush1.bf16.msra.mxu1 %v3218_v22  ;;  %v3312_v21 = vld [vmem:[%s4659_s1 + $0x46c] ss:$16 sps:$4 sm:$0xff]   ;;  %v3307_v22 = vld [vmem:[%s4659_s1 + $0x460] ss:$16 sps:$4 sm:$0xff]  }
  0x54   :  { %1308 = vmatprep.subr.bf16.mxu0 %v3223_v23  ;;  %1472 = vmatprep.subr.bf16.mxu1 %v3226_v24  ;;  %v3310_v23 = vld [vmem:[%s4659_s1 + $0x468] ss:$16 sps:$4 sm:$0xff]   ;;  %v3315_v24 = vld [vmem:[%s4659_s1 + $0x484] ss:$16 sps:$4 sm:$0xff]  }
  0x57   :  { %1309 = vmatpush1.bf16.msra.mxu0 %v3221_v25  ;;  %1473 = vmatpush1.bf16.msra.mxu1 %v3224_v26  ;;  %v3318_v25 = vld [vmem:[%s4659_s1 + $0x48c] ss:$16 sps:$4 sm:$0xff]   ;;  %v3313_v26 = vld [vmem:[%s4659_s1 + $0x480] ss:$16 sps:$4 sm:$0xff]  }
  0x58   :  { %1310 = vmatprep.subr.bf16.mxu0 %v3229_v27  ;;  %1474 = vmatprep.subr.bf16.mxu1 %v3232_v28  ;;  %v3316_v27 = vld [vmem:[%s4659_s1 + $0x488] ss:$16 sps:$4 sm:$0xff]   ;;  %v3321_v28 = vld [vmem:[%s4659_s1 + $0x4a4] ss:$16 sps:$4 sm:$0xff]  }
  0x5b   :  { %1311 = vmatpush1.bf16.msra.mxu0 %v3227_v30  ;;  %1475 = vmatpush1.bf16.msra.mxu1 %v3230_v31  ;;  %v3319_v30 = vld [vmem:[%s4659_s1 + $0x4a0] ss:$16 sps:$4 sm:$0xff]   ;;  %v3322_v31 = vld [vmem:[%s4659_s1 + $0x4a8] ss:$16 sps:$4 sm:$0xff]  }
  0x5c   :  { %1312 = vmatprep.subr.bf16.mxu0 %v3235_v33  ;;  %1476 = vmatprep.subr.bf16.mxu1 %v3238_v34  ;;  %v3330_v33 = vld [vmem:[%s4659_s1 + $0x4cc] ss:$16 sps:$4 sm:$0xff]   ;;  %v3325_v34 = vld [vmem:[%s4659_s1 + $0x4c0] ss:$16 sps:$4 sm:$0xff]  }
  0x5f   :  { %1313 = vmatpush1.bf16.msra.mxu0 %v3233_v35  ;;  %1477 = vmatpush1.bf16.msra.mxu1 %v3236_v36  ;;  %v3328_v35 = vld [vmem:[%s4659_s1 + $0x4c8] ss:$16 sps:$4 sm:$0xff]   ;;  %v3333_v36 = vld [vmem:[%s4659_s1 + $0x4e4] ss:$16 sps:$4 sm:$0xff]  }
  0x60   :  { %1314 = vmatprep.subr.bf16.mxu0 %v3241_v37  ;;  %1478 = vmatprep.subr.bf16.mxu1 %v3244_v38  ;;  %v3336_v37 = vld [vmem:[%s4659_s1 + $0x4ec] ss:$16 sps:$4 sm:$0xff]   ;;  %v3331_v38 = vld [vmem:[%s4659_s1 + $0x4e0] ss:$16 sps:$4 sm:$0xff]  }
  0x63   :  { %1315 = vmatpush1.bf16.msra.mxu0 %v3239_v39  ;;  %1479 = vmatpush1.bf16.msra.mxu1 %v3242_v40  ;;  %v3334_v39 = vld [vmem:[%s4659_s1 + $0x4e8] ss:$16 sps:$4 sm:$0xff]   ;;  %v3339_v40 = vld [vmem:[%s4659_s1 + $0x504] ss:$16 sps:$4 sm:$0xff]  }
  0x64   :  { %1316 = vmatprep.subr.bf16.mxu0 %v3247_v41  ;;  %1480 = vmatprep.subr.bf16.mxu1 %v3250_v42  ;;  %v3342_v41 = vld [vmem:[%s4659_s1 + $0x50c] ss:$16 sps:$4 sm:$0xff]   ;;  %v3337_v42 = vld [vmem:[%s4659_s1 + $0x500] ss:$16 sps:$4 sm:$0xff]  }
  0x67   :  { %1317 = vmatpush1.bf16.msra.mxu0 %v3245_v43  ;;  %1481 = vmatpush1.bf16.msra.mxu1 %v3248_v44  ;;  %v3340_v43 = vld [vmem:[%s4659_s1 + $0x508] ss:$16 sps:$4 sm:$0xff]   ;;  %v3345_v44 = vld [vmem:[%s4659_s1 + $0x524] ss:$16 sps:$4 sm:$0xff]  }
  0x68   :  { %1318 = vmatprep.subr.bf16.mxu0 %v3253_v45  ;;  %1482 = vmatprep.subr.bf16.mxu1 %v3256_v46  ;;  %v3348_v45 = vld [vmem:[%s4659_s1 + $0x52c] ss:$16 sps:$4 sm:$0xff]   ;;  %v3343_v46 = vld [vmem:[%s4659_s1 + $0x520] ss:$16 sps:$4 sm:$0xff]  }
  0x6b   :  { %1319 = vmatpush1.bf16.msra.mxu0 %v3251_v47  ;;  %1483 = vmatpush1.bf16.msra.mxu1 %v3254_v48  ;;  %v3346_v47 = vld [vmem:[%s4659_s1 + $0x528] ss:$16 sps:$4 sm:$0xff]   ;;  %v3351_v48 = vld [vmem:[%s4659_s1 + $0x544] ss:$16 sps:$4 sm:$0xff]  }
  0x6c   :  { %1320 = vmatprep.subr.bf16.mxu0 %v3259_v49  ;;  %1484 = vmatprep.subr.bf16.mxu1 %v3262_v50  ;;  %v3354_v49 = vld [vmem:[%s4659_s1 + $0x54c] ss:$16 sps:$4 sm:$0xff]   ;;  %v3349_v50 = vld [vmem:[%s4659_s1 + $0x540] ss:$16 sps:$4 sm:$0xff]  }
  0x6f   :  { %1321 = vmatpush1.bf16.msra.mxu0 %v3257_v51  ;;  %1485 = vmatpush1.bf16.msra.mxu1 %v3260_v52  ;;  %v3352_v51 = vld [vmem:[%s4659_s1 + $0x548] ss:$16 sps:$4 sm:$0xff]   ;;  %v3357_v52 = vld [vmem:[%s4659_s1 + $0x564] ss:$16 sps:$4 sm:$0xff]  }
  0x70   :  { %1322 = vmatprep.subr.bf16.mxu0 %v3265_v53  ;;  %1486 = vmatprep.subr.bf16.mxu1 %v3268_v54  ;;  %v3360_v53 = vld [vmem:[%s4659_s1 + $0x56c] ss:$16 sps:$4 sm:$0xff]   ;;  %v3355_v54 = vld [vmem:[%s4659_s1 + $0x560] ss:$16 sps:$4 sm:$0xff]  }
  0x73   :  { %1323 = vmatpush1.bf16.msra.mxu0 %v3263_v55  ;;  %1487 = vmatpush1.bf16.msra.mxu1 %v3266_v56  ;;  %v3358_v55 = vld [vmem:[%s4659_s1 + $0x568] ss:$16 sps:$4 sm:$0xff]   ;;  %v3363_v56 = vld [vmem:[%s4659_s1 + $0x584] ss:$16 sps:$4 sm:$0xff]  }
  0x74   :  { %1324 = vmatprep.subr.bf16.mxu0 %v3271_v57  ;;  %1488 = vmatprep.subr.bf16.mxu1 %v3274_v58  ;;  %v3366_v57 = vld [vmem:[%s4659_s1 + $0x58c] ss:$16 sps:$4 sm:$0xff]   ;;  %v3361_v58 = vld [vmem:[%s4659_s1 + $0x580] ss:$16 sps:$4 sm:$0xff]  }
  0x77   :  { %1325 = vmatpush1.bf16.msra.mxu0 %v3269_v59  ;;  %1489 = vmatpush1.bf16.msra.mxu1 %v3272_v60  ;;  %v3364_v59 = vld [vmem:[%s4659_s1 + $0x588] ss:$16 sps:$4 sm:$0xff]   ;;  %v3369_v60 = vld [vmem:[%s4659_s1 + $0x5a4] ss:$16 sps:$4 sm:$0xff]  }
  0x78   :  { %1326 = vmatprep.subr.bf16.mxu0 %v3277_v61  ;;  %1490 = vmatprep.subr.bf16.mxu1 %v3280_v62  ;;  %v3372_v61 = vld [vmem:[%s4659_s1 + $0x5ac] ss:$16 sps:$4 sm:$0xff]   ;;  %v3367_v62 = vld [vmem:[%s4659_s1 + $0x5a0] ss:$16 sps:$4 sm:$0xff]  }
  0x7b   :  { %1327 = vmatpush1.bf16.msra.mxu0 %v3275_v63  ;;  %1491 = vmatpush1.bf16.msra.mxu1 %v3278_v0  ;;  %v3370_v63 = vld [vmem:[%s4659_s1 + $0x5a8] ss:$16 sps:$4 sm:$0xff]   ;;  %v3375_v0 = vld [vmem:[%s4659_s1 + $0x5c4] ss:$16 sps:$4 sm:$0xff]  }
  0x7c   :  { %1328 = vmatprep.subr.bf16.mxu0 %v3283_v1  ;;  %1492 = vmatprep.subr.bf16.mxu1 %v3286_v2  ;;  %v3378_v1 = vld [vmem:[%s4659_s1 + $0x5cc] ss:$16 sps:$4 sm:$0xff]   ;;  %v3373_v2 = vld [vmem:[%s4659_s1 + $0x5c0] ss:$16 sps:$4 sm:$0xff]  }
  0x7f   :  { %1329 = vmatpush1.bf16.msra.mxu0 %v3281_v3  ;;  %1493 = vmatpush1.bf16.msra.mxu1 %v3284_v4  ;;  %v3376_v3 = vld [vmem:[%s4659_s1 + $0x5c8] ss:$16 sps:$4 sm:$0xff]   ;;  %v3381_v4 = vld [vmem:[%s4659_s1 + $0x5e4] ss:$16 sps:$4 sm:$0xff]  }
  0x80   :  { %1339 = vmatprep.subr.bf16.mxu0 %v3291_v5  ;;  %1503 = vmatprep.subr.bf16.mxu1 %v3294_v6  ;;  %v3384_v5 = vld [vmem:[%s4659_s1 + $0x5ec] ss:$16 sps:$4 sm:$0xff]   ;;  %v3379_v6 = vld [vmem:[%s4659_s1 + $0x5e0] ss:$16 sps:$4 sm:$0xff]  }
  0x82   :  { %1331 = vmatmul.mubr.bf16.vlgmr.msra.gmra.mrb[0].mxu0 %v2697_v7  ;;  %1495 = vmatmul.mubr.bf16.vlgmr.msra.gmra.mrb[0].mxu1 %v2697_v7  ;;  %v3382_v7 = vld [vmem:[%s4659_s1 + $0x5e8] ss:$16 sps:$4 sm:$0xff]  }
  0x83   :  { %1340 = vmatpush1.bf16.msra.mxu0 %v3289_v8  ;;  %1504 = vmatpush1.bf16.msra.mxu1 %v3292_v9  ;;  %v3389_v8 = vld [vmem:[%s4659_s1 + $0x604] ss:$16 sps:$4 sm:$0xff]   ;;  %v3392_v9 = vld [vmem:[%s4659_s1 + $0x60c] ss:$16 sps:$4 sm:$0xff]  }
  0x84   :  { %1341 = vmatprep.subr.bf16.mxu0 %v3297_v10  ;;  %1505 = vmatprep.subr.bf16.mxu1 %v3300_v11  ;;  %v2699_v10 = vcombine.low %v4030_v12, %v4030_v12  ;;  %v3387_v11 = vld [vmem:[%s4659_s1 + $0x600] ss:$16 sps:$4 sm:$0xff]   ;;  %v3398_v12 = vld [vmem:[%s4661_s3 + $0xc] ss:$16 sps:$4 sm:$0xff]  }
  0x85   :  { %1371 = vmatprep.mubr.bf16.mxu0 %v2700_v13  ;;  %1535 = vmatprep.mubr.bf16.mxu1 %v2700_v13  ;;  %v3390_v13 = vld [vmem:[%s4659_s1 + $0x608] ss:$16 sps:$4 sm:$0xff]  }
  0x87   :  { %1342 = vmatpush1.bf16.msra.mxu0 %v3295_v14  ;;  %1506 = vmatpush1.bf16.msra.mxu1 %v3298_v15  ;;  %v3395_v14 = vld [vmem:[%s4661_s3 + $0x4] ss:$16 sps:$4 sm:$0xff]   ;;  %v3572_v15 = vmov 0  }
  0x88   :  { %1343 = vmatprep.subr.bf16.mxu0 %v3303_v16  ;;  %1507 = vmatprep.subr.bf16.mxu1 %v3306_v17  ;;  %v3190_v16 = vld [vmem:[%s4660_s0 + $0x18] ss:$0 sps:$4 sm:$0xff]   ;;  %v3393_v17 = vld [vmem:[%s4661_s3] ss:$16 sps:$4 sm:$0xff]  }
  0x8b   :  { %1344 = vmatpush1.bf16.msra.mxu0 %v3301_v18  ;;  %1508 = vmatpush1.bf16.msra.mxu1 %v3304_v19  ;;  %v3396_v18 = vld [vmem:[%s4661_s3 + $0x8] ss:$16 sps:$4 sm:$0xff]   ;;  %v3401_v19 = vld [vmem:[%s4661_s3 + $0x24] ss:$16 sps:$4 sm:$0xff]  }
  0x8c   :  { %1345 = vmatprep.subr.bf16.mxu0 %v3309_v20  ;;  %1509 = vmatprep.subr.bf16.mxu1 %v3312_v21  ;;  %v3404_v20 = vld [vmem:[%s4661_s3 + $0x2c] ss:$16 sps:$4 sm:$0xff]   ;;  %v3399_v21 = vld [vmem:[%s4661_s3 + $0x20] ss:$16 sps:$4 sm:$0xff]  }
  0x8f   :  { %1346 = vmatpush1.bf16.msra.mxu0 %v3307_v22  ;;  %1510 = vmatpush1.bf16.msra.mxu1 %v3310_v23  ;;  %v3402_v22 = vld [vmem:[%s4661_s3 + $0x28] ss:$16 sps:$4 sm:$0xff]   ;;  %v3407_v23 = vld [vmem:[%s4661_s3 + $0x44] ss:$16 sps:$4 sm:$0xff]  }
  0x90   :  { %1347 = vmatprep.subr.bf16.mxu0 %v3315_v24  ;;  %1511 = vmatprep.subr.bf16.mxu1 %v3318_v25  ;;  %v3410_v24 = vld [vmem:[%s4661_s3 + $0x4c] ss:$16 sps:$4 sm:$0xff]   ;;  %v3405_v25 = vld [vmem:[%s4661_s3 + $0x40] ss:$16 sps:$4 sm:$0xff]  }
  0x93   :  { %1348 = vmatpush1.bf16.msra.mxu0 %v3313_v26  ;;  %1512 = vmatpush1.bf16.msra.mxu1 %v3316_v27  ;;  %v3408_v26 = vld [vmem:[%s4661_s3 + $0x48] ss:$16 sps:$4 sm:$0xff]   ;;  %v3413_v27 = vld [vmem:[%s4661_s3 + $0x64] ss:$16 sps:$4 sm:$0xff]  }
  0x94   :  { %1349 = vmatprep.subr.bf16.mxu0 %v3321_v28  ;;  %1513 = vmatprep.subr.bf16.mxu1 %v3324_v29  ;;  %v3416_v28 = vld [vmem:[%s4661_s3 + $0x6c] ss:$16 sps:$4 sm:$0xff]   ;;  %v3411_v29 = vld [vmem:[%s4661_s3 + $0x60] ss:$16 sps:$4 sm:$0xff]  }
  0x97   :  { %1350 = vmatpush1.bf16.msra.mxu0 %v3319_v30  ;;  %1514 = vmatpush1.bf16.msra.mxu1 %v3322_v31  ;;  %v3414_v30 = vld [vmem:[%s4661_s3 + $0x68] ss:$16 sps:$4 sm:$0xff]   ;;  %v3419_v31 = vld [vmem:[%s4661_s3 + $0x84] ss:$16 sps:$4 sm:$0xff]  }
  0x98   :  { %1351 = vmatprep.subr.bf16.mxu0 %v3327_v32  ;;  %1515 = vmatprep.subr.bf16.mxu1 %v3330_v33  ;;  %v3422_v32 = vld [vmem:[%s4661_s3 + $0x8c] ss:$16 sps:$4 sm:$0xff]   ;;  %v3417_v33 = vld [vmem:[%s4661_s3 + $0x80] ss:$16 sps:$4 sm:$0xff]  }
  0x9b   :  { %1352 = vmatpush1.bf16.msra.mxu0 %v3325_v34  ;;  %1516 = vmatpush1.bf16.msra.mxu1 %v3328_v35  ;;  %v3420_v34 = vld [vmem:[%s4661_s3 + $0x88] ss:$16 sps:$4 sm:$0xff]   ;;  %v3425_v35 = vld [vmem:[%s4661_s3 + $0xa4] ss:$16 sps:$4 sm:$0xff]  }
  0x9c   :  { %1353 = vmatprep.subr.bf16.mxu0 %v3333_v36  ;;  %1517 = vmatprep.subr.bf16.mxu1 %v3336_v37  ;;  %v3428_v36 = vld [vmem:[%s4661_s3 + $0xac] ss:$16 sps:$4 sm:$0xff]   ;;  %v3423_v37 = vld [vmem:[%s4661_s3 + $0xa0] ss:$16 sps:$4 sm:$0xff]  }
  0x9f   :  { %1354 = vmatpush1.bf16.msra.mxu0 %v3331_v38  ;;  %1518 = vmatpush1.bf16.msra.mxu1 %v3334_v39  ;;  %v3426_v38 = vld [vmem:[%s4661_s3 + $0xa8] ss:$16 sps:$4 sm:$0xff]   ;;  %v3431_v39 = vld [vmem:[%s4661_s3 + $0xc4] ss:$16 sps:$4 sm:$0xff]  }
  0xa0   :  { %1355 = vmatprep.subr.bf16.mxu0 %v3339_v40  ;;  %1519 = vmatprep.subr.bf16.mxu1 %v3342_v41  ;;  %v3434_v40 = vld [vmem:[%s4661_s3 + $0xcc] ss:$16 sps:$4 sm:$0xff]   ;;  %v3429_v41 = vld [vmem:[%s4661_s3 + $0xc0] ss:$16 sps:$4 sm:$0xff]  }
  0xa3   :  { %1356 = vmatpush1.bf16.msra.mxu0 %v3337_v42  ;;  %1520 = vmatpush1.bf16.msra.mxu1 %v3340_v43  ;;  %v3432_v42 = vld [vmem:[%s4661_s3 + $0xc8] ss:$16 sps:$4 sm:$0xff]   ;;  %v3437_v43 = vld [vmem:[%s4661_s3 + $0xe4] ss:$16 sps:$4 sm:$0xff]  }
  0xa4   :  { %1357 = vmatprep.subr.bf16.mxu0 %v3345_v44  ;;  %1521 = vmatprep.subr.bf16.mxu1 %v3348_v45  ;;  %v3440_v44 = vld [vmem:[%s4661_s3 + $0xec] ss:$16 sps:$4 sm:$0xff]   ;;  %v3435_v45 = vld [vmem:[%s4661_s3 + $0xe0] ss:$16 sps:$4 sm:$0xff]  }
  0xa7   :  { %1358 = vmatpush1.bf16.msra.mxu0 %v3343_v46  ;;  %1522 = vmatpush1.bf16.msra.mxu1 %v3346_v47  ;;  %v3438_v46 = vld [vmem:[%s4661_s3 + $0xe8] ss:$16 sps:$4 sm:$0xff]   ;;  %v3443_v47 = vld [vmem:[%s4661_s3 + $0x104] ss:$16 sps:$4 sm:$0xff]  }
  0xa8   :  { %1359 = vmatprep.subr.bf16.mxu0 %v3351_v48  ;;  %1523 = vmatprep.subr.bf16.mxu1 %v3354_v49  ;;  %v3446_v48 = vld [vmem:[%s4661_s3 + $0x10c] ss:$16 sps:$4 sm:$0xff]   ;;  %v3441_v49 = vld [vmem:[%s4661_s3 + $0x100] ss:$16 sps:$4 sm:$0xff]  }
  0xab   :  { %1360 = vmatpush1.bf16.msra.mxu0 %v3349_v50  ;;  %1524 = vmatpush1.bf16.msra.mxu1 %v3352_v51  ;;  %v3444_v50 = vld [vmem:[%s4661_s3 + $0x108] ss:$16 sps:$4 sm:$0xff]   ;;  %v3449_v51 = vld [vmem:[%s4661_s3 + $0x124] ss:$16 sps:$4 sm:$0xff]  }
  0xac   :  { %1361 = vmatprep.subr.bf16.mxu0 %v3357_v52  ;;  %1525 = vmatprep.subr.bf16.mxu1 %v3360_v53  ;;  %v3452_v52 = vld [vmem:[%s4661_s3 + $0x12c] ss:$16 sps:$4 sm:$0xff]   ;;  %v3447_v53 = vld [vmem:[%s4661_s3 + $0x120] ss:$16 sps:$4 sm:$0xff]  }
  0xaf   :  { %1362 = vmatpush1.bf16.msra.mxu0 %v3355_v54  ;;  %1526 = vmatpush1.bf16.msra.mxu1 %v3358_v55  ;;  %v3450_v54 = vld [vmem:[%s4661_s3 + $0x128] ss:$16 sps:$4 sm:$0xff]   ;;  %v3455_v55 = vld [vmem:[%s4661_s3 + $0x144] ss:$16 sps:$4 sm:$0xff]  }
  0xb0   :  { %1363 = vmatprep.subr.bf16.mxu0 %v3363_v56  ;;  %1527 = vmatprep.subr.bf16.mxu1 %v3366_v57  ;;  %v3458_v56 = vld [vmem:[%s4661_s3 + $0x14c] ss:$16 sps:$4 sm:$0xff]   ;;  %v3453_v57 = vld [vmem:[%s4661_s3 + $0x140] ss:$16 sps:$4 sm:$0xff]  }
  0xb3   :  { %1364 = vmatpush1.bf16.msra.mxu0 %v3361_v58  ;;  %1528 = vmatpush1.bf16.msra.mxu1 %v3364_v59  ;;  %v3456_v58 = vld [vmem:[%s4661_s3 + $0x148] ss:$16 sps:$4 sm:$0xff]   ;;  %v3461_v59 = vld [vmem:[%s4661_s3 + $0x164] ss:$16 sps:$4 sm:$0xff]  }
  0xb4   :  { %1365 = vmatprep.subr.bf16.mxu0 %v3369_v60  ;;  %1529 = vmatprep.subr.bf16.mxu1 %v3372_v61  ;;  %v3464_v60 = vld [vmem:[%s4661_s3 + $0x16c] ss:$16 sps:$4 sm:$0xff]   ;;  %v3459_v61 = vld [vmem:[%s4661_s3 + $0x160] ss:$16 sps:$4 sm:$0xff]  }
  0xb7   :  { %1366 = vmatpush1.bf16.msra.mxu0 %v3367_v62  ;;  %1530 = vmatpush1.bf16.msra.mxu1 %v3370_v63  ;;  %v3462_v62 = vld [vmem:[%s4661_s3 + $0x168] ss:$16 sps:$4 sm:$0xff]   ;;  %v3467_v63 = vld [vmem:[%s4661_s3 + $0x184] ss:$16 sps:$4 sm:$0xff]  }
  0xb8   :  { %1367 = vmatprep.subr.bf16.mxu0 %v3375_v0  ;;  %1531 = vmatprep.subr.bf16.mxu1 %v3378_v1  ;;  %v3470_v0 = vld [vmem:[%s4661_s3 + $0x18c] ss:$16 sps:$4 sm:$0xff]   ;;  %v3465_v1 = vld [vmem:[%s4661_s3 + $0x180] ss:$16 sps:$4 sm:$0xff]  }
  0xbb   :  { %1368 = vmatpush1.bf16.msra.mxu0 %v3373_v2  ;;  %1532 = vmatpush1.bf16.msra.mxu1 %v3376_v3  ;;  %v3468_v2 = vld [vmem:[%s4661_s3 + $0x188] ss:$16 sps:$4 sm:$0xff]   ;;  %v3473_v3 = vld [vmem:[%s4661_s3 + $0x1a4] ss:$16 sps:$4 sm:$0xff]  }
  0xbc   :  { %1369 = vmatprep.subr.bf16.mxu0 %v3381_v4  ;;  %1533 = vmatprep.subr.bf16.mxu1 %v3384_v5  ;;  %v3476_v4 = vld [vmem:[%s4661_s3 + $0x1ac] ss:$16 sps:$4 sm:$0xff]   ;;  %v3471_v5 = vld [vmem:[%s4661_s3 + $0x1a0] ss:$16 sps:$4 sm:$0xff]  }
  0xbf   :  { %1370 = vmatpush1.bf16.msra.mxu0 %v3379_v6  ;;  %1534 = vmatpush1.bf16.msra.mxu1 %v3382_v7  ;;  %v3474_v6 = vld [vmem:[%s4661_s3 + $0x1a8] ss:$16 sps:$4 sm:$0xff]   ;;  %v3479_v7 = vld [vmem:[%s4661_s3 + $0x1c4] ss:$16 sps:$4 sm:$0xff]  }
  0xc0   :  { %1380 = vmatprep.subr.bf16.mxu0 %v3389_v8  ;;  %1544 = vmatprep.subr.bf16.mxu1 %v3392_v9  ;;  %v3482_v8 = vld [vmem:[%s4661_s3 + $0x1cc] ss:$16 sps:$4 sm:$0xff]   ;;  %v3477_v9 = vld [vmem:[%s4661_s3 + $0x1c0] ss:$16 sps:$4 sm:$0xff]  }
  0xc2   :  { %1372 = vmatmul.mubr.bf16.vlgmr.msra.gmra.mrb[0].mxu0 %v2699_v10  ;;  %1536 = vmatmul.mubr.bf16.vlgmr.msra.gmra.mrb[0].mxu1 %v2699_v10  ;;  %v3480_v10 = vld [vmem:[%s4661_s3 + $0x1c8] ss:$16 sps:$4 sm:$0xff]  }
  0xc3   :  { %1381 = vmatpush1.bf16.msra.mxu0 %v3387_v11  ;;  %1545 = vmatpush1.bf16.msra.mxu1 %v3390_v13  ;;  %v3485_v11 = vld [vmem:[%s4661_s3 + $0x1e4] ss:$16 sps:$4 sm:$0xff]   ;;  %v3488_v13 = vld [vmem:[%s4661_s3 + $0x1ec] ss:$16 sps:$4 sm:$0xff]  }
  0xc4   :  { %1412 = vmatprep.mubr.bf16.mxu0 %v3572_v15  ;;  %1576 = vmatprep.mubr.bf16.mxu1 %v3572_v15 }
  0xc5   :  { %2218 = vmatprep.subr.bf16.mxu0 %v3395_v14  ;;  %2300 = vmatprep.subr.bf16.mxu1 %v3398_v12  ;;  %v3483_v14 = vld [vmem:[%s4661_s3 + $0x1e0] ss:$16 sps:$4 sm:$0xff]   ;;  %v3486_v12 = vld [vmem:[%s4661_s3 + $0x1e8] ss:$16 sps:$4 sm:$0xff]  }
  0xce   :  { %2898 = vmatmul.mubr.msk.bf16.vlgmr.msra.gmra.mrb[0].mxu0 %vm1253_vm0, %v3190_v16  ;;  %2899 = vmatmul.mubr.msk.bf16.vlgmr.msra.gmra.mrb[0].mxu1 %vm1253_vm0, %v3190_v16  ;;  %v3491_v16 = vld [vmem:[%s4661_s3 + $0x204] ss:$16 sps:$4 sm:$0xff]  }
  0xcf   :  { %2219 = vmatpush1.bf16.msra.mxu0 %v3393_v17  ;;  %2301 = vmatpush1.bf16.msra.mxu1 %v3396_v18  ;;  %v3494_v17 = vld [vmem:[%s4661_s3 + $0x20c] ss:$16 sps:$4 sm:$0xff]   ;;  %v229_v18 = vlaneseq }
  0xd0   :  { %2220 = vmatprep.subr.bf16.mxu0 %v3401_v19  ;;  %2302 = vmatprep.subr.bf16.mxu1 %v3404_v20 }
  0xd1   :  { %v4427_v19 = vshrl.u32 %v229_v18, 7 }
  0xd3   :  { %2221 = vmatpush1.bf16.msra.mxu0 %v3399_v21  ;;  %2303 = vmatpush1.bf16.msra.mxu1 %v3402_v22  ;;  %v231_v20 = vsub.s32 0, %v4427_v19  ;;  %v4433_v21 = vld [vmem:[%s4663_s2] sm:$0xf]  ;;  %v235_v22 = vsub.s32 1, %v4427_v19 }
  0xd4   :  { %2222 = vmatprep.subr.bf16.mxu0 %v3407_v23  ;;  %2304 = vmatprep.subr.bf16.mxu1 %v3410_v24  ;;  %v243_v23 = vsub.s32 3, %v4427_v19 }
  0xd5   :  { %v232_v24 = vrot.slane %v4433_v21, %v231_v20 }
  0xd7   :  { %2223 = vmatpush1.bf16.msra.mxu0 %v3405_v25  ;;  %2305 = vmatpush1.bf16.msra.mxu1 %v3408_v26  ;;  %v236_v25 = vrot.slane %v4433_v21, %v235_v22  ;;  %v244_v26 = vrot.slane %v4433_v21, %v243_v23 }
  0xd8   :  { %2224 = vmatprep.subr.bf16.mxu0 %v3413_v27  ;;  %2306 = vmatprep.subr.bf16.mxu1 %v3416_v28 }
  0xdb   :  { %2225 = vmatpush1.bf16.msra.mxu0 %v3411_v29  ;;  %2307 = vmatpush1.bf16.msra.mxu1 %v3414_v30 }
  0xdc   :  { %2226 = vmatprep.subr.bf16.mxu0 %v3419_v31  ;;  %2308 = vmatprep.subr.bf16.mxu1 %v3422_v32 }
  0xdf   :  { %2227 = vmatpush1.bf16.msra.mxu0 %v3417_v33  ;;  %2309 = vmatpush1.bf16.msra.mxu1 %v3420_v34 }
  0xe0   :  { %2228 = vmatprep.subr.bf16.mxu0 %v3425_v35  ;;  %2310 = vmatprep.subr.bf16.mxu1 %v3428_v36 }
  0xe3   :  { %2229 = vmatpush1.bf16.msra.mxu0 %v3423_v37  ;;  %2311 = vmatpush1.bf16.msra.mxu1 %v3426_v38 }
  0xe4   :  { %2230 = vmatprep.subr.bf16.mxu0 %v3431_v39  ;;  %2312 = vmatprep.subr.bf16.mxu1 %v3434_v40 }
  0xe7   :  { %2231 = vmatpush1.bf16.msra.mxu0 %v3429_v41  ;;  %2313 = vmatpush1.bf16.msra.mxu1 %v3432_v42  ;;  %v3489_v42 = vld [vmem:[%s4661_s3 + $0x200] ss:$16 sps:$4 sm:$0xff]  }
  0xe8   :  { %2232 = vmatprep.subr.bf16.mxu0 %v3437_v43  ;;  %2314 = vmatprep.subr.bf16.mxu1 %v3440_v44  ;;  %v3492_v43 = vld [vmem:[%s4661_s3 + $0x208] ss:$16 sps:$4 sm:$0xff]  }
  0xeb   :  { %2233 = vmatpush1.bf16.msra.mxu0 %v3435_v45  ;;  %2315 = vmatpush1.bf16.msra.mxu1 %v3438_v46  ;;  %v3497_v45 = vld [vmem:[%s4661_s3 + $0x224] ss:$16 sps:$4 sm:$0xff]   ;;  %v3500_v46 = vld [vmem:[%s4661_s3 + $0x22c] ss:$16 sps:$4 sm:$0xff]  }
  0xec   :  { %2234 = vmatprep.subr.bf16.mxu0 %v3443_v47  ;;  %2316 = vmatprep.subr.bf16.mxu1 %v3446_v48  ;;  %v3495_v48 = vld [vmem:[%s4661_s3 + $0x220] ss:$16 sps:$4 sm:$0xff]  }
  0xef   :  { %2235 = vmatpush1.bf16.msra.mxu0 %v3441_v49  ;;  %2317 = vmatpush1.bf16.msra.mxu1 %v3444_v50  ;;  %v3498_v49 = vld [vmem:[%s4661_s3 + $0x228] ss:$16 sps:$4 sm:$0xff]   ;;  %v3503_v50 = vld [vmem:[%s4661_s3 + $0x244] ss:$16 sps:$4 sm:$0xff]  }
  0xf0   :  { %2236 = vmatprep.subr.bf16.mxu0 %v3449_v51  ;;  %2318 = vmatprep.subr.bf16.mxu1 %v3452_v52  ;;  %v3506_v51 = vld [vmem:[%s4661_s3 + $0x24c] ss:$16 sps:$4 sm:$0xff]   ;;  %v3501_v52 = vld [vmem:[%s4661_s3 + $0x240] ss:$16 sps:$4 sm:$0xff]  }
  0xf3   :  { %2237 = vmatpush1.bf16.msra.mxu0 %v3447_v53  ;;  %2319 = vmatpush1.bf16.msra.mxu1 %v3450_v54  ;;  %v3504_v53 = vld [vmem:[%s4661_s3 + $0x248] ss:$16 sps:$4 sm:$0xff]   ;;  %v3509_v54 = vld [vmem:[%s4661_s3 + $0x264] ss:$16 sps:$4 sm:$0xff]  }
  0xf4   :  { %2238 = vmatprep.subr.bf16.mxu0 %v3455_v55  ;;  %2320 = vmatprep.subr.bf16.mxu1 %v3458_v56  ;;  %v3512_v55 = vld [vmem:[%s4661_s3 + $0x26c] ss:$16 sps:$4 sm:$0xff]   ;;  %v3507_v56 = vld [vmem:[%s4661_s3 + $0x260] ss:$16 sps:$4 sm:$0xff]  }
  0xf7   :  { %2239 = vmatpush1.bf16.msra.mxu0 %v3453_v57  ;;  %2321 = vmatpush1.bf16.msra.mxu1 %v3456_v58  ;;  %v3510_v57 = vld [vmem:[%s4661_s3 + $0x268] ss:$16 sps:$4 sm:$0xff]   ;;  %v3515_v58 = vld [vmem:[%s4661_s3 + $0x284] ss:$16 sps:$4 sm:$0xff]  }
  0xf8   :  { %2240 = vmatprep.subr.bf16.mxu0 %v3461_v59  ;;  %2322 = vmatprep.subr.bf16.mxu1 %v3464_v60  ;;  %v3518_v59 = vld [vmem:[%s4661_s3 + $0x28c] ss:$16 sps:$4 sm:$0xff]   ;;  %v3513_v60 = vld [vmem:[%s4661_s3 + $0x280] ss:$16 sps:$4 sm:$0xff]  }
  0xfb   :  { %2241 = vmatpush1.bf16.msra.mxu0 %v3459_v61  ;;  %2323 = vmatpush1.bf16.msra.mxu1 %v3462_v62  ;;  %v3516_v61 = vld [vmem:[%s4661_s3 + $0x288] ss:$16 sps:$4 sm:$0xff]   ;;  %v3521_v62 = vld [vmem:[%s4661_s3 + $0x2a4] ss:$16 sps:$4 sm:$0xff]  }
  0xfc   :  { %2242 = vmatprep.subr.bf16.mxu0 %v3467_v63  ;;  %2324 = vmatprep.subr.bf16.mxu1 %v3470_v0  ;;  %v3524_v63 = vld [vmem:[%s4661_s3 + $0x2ac] ss:$16 sps:$4 sm:$0xff]   ;;  %v3519_v0 = vld [vmem:[%s4661_s3 + $0x2a0] ss:$16 sps:$4 sm:$0xff]  }
  0xff   :  { %2243 = vmatpush1.bf16.msra.mxu0 %v3465_v1  ;;  %2325 = vmatpush1.bf16.msra.mxu1 %v3468_v2  ;;  %v3522_v1 = vld [vmem:[%s4661_s3 + $0x2a8] ss:$16 sps:$4 sm:$0xff]   ;;  %v239_v2 = vsub.s32 2, %v4427_v19 }
 0x100   :  { %2244 = vmatprep.subr.bf16.mxu0 %v3473_v3  ;;  %2326 = vmatprep.subr.bf16.mxu1 %v3476_v4  ;;  %v3527_v3 = vld [vmem:[%s4661_s3 + $0x2c4] ss:$16 sps:$4 sm:$0xff]   ;;  %v3530_v4 = vld [vmem:[%s4661_s3 + $0x2cc] ss:$16 sps:$4 sm:$0xff]  }
 0x103   :  { %2245 = vmatpush1.bf16.msra.mxu0 %v3471_v5  ;;  %2327 = vmatpush1.bf16.msra.mxu1 %v3474_v6  ;;  %v3525_v5 = vld [vmem:[%s4661_s3 + $0x2c0] ss:$16 sps:$4 sm:$0xff]   ;;  %v3528_v6 = vld [vmem:[%s4661_s3 + $0x2c8] ss:$16 sps:$4 sm:$0xff]  }
 0x104   :  { %2246 = vmatprep.subr.bf16.mxu0 %v3479_v7  ;;  %2328 = vmatprep.subr.bf16.mxu1 %v3482_v8  ;;  %v240_v7 = vrot.slane %v4433_v21, %v239_v2  ;;  %v3533_v8 = vld [vmem:[%s4661_s3 + $0x2e4] ss:$16 sps:$4 sm:$0xff]  }
 0x105   :  { %v3544_v21 = vld [vmem:[%s4662_s5 + $0x40] sm:$0xff]  }
 0x107   :  { %2247 = vmatpush1.bf16.msra.mxu0 %v3477_v9  ;;  %2329 = vmatpush1.bf16.msra.mxu1 %v3480_v10  ;;  %v3536_v9 = vld [vmem:[%s4661_s3 + $0x2ec] ss:$16 sps:$4 sm:$0xff]   ;;  %v3531_v10 = vld [vmem:[%s4661_s3 + $0x2e0] ss:$16 sps:$4 sm:$0xff]  }
 0x108   :  { %2248 = vmatprep.subr.bf16.mxu0 %v3485_v11  ;;  %2330 = vmatprep.subr.bf16.mxu1 %v3488_v13  ;;  %v3534_v11 = vld [vmem:[%s4661_s3 + $0x2e8] ss:$16 sps:$4 sm:$0xff]  }
 0x10b   :  { %2249 = vmatpush1.bf16.msra.mxu0 %v3483_v14  ;;  %2331 = vmatpush1.bf16.msra.mxu1 %v3486_v12  ;;  %v3539_v14 = vld [vmem:[%s4661_s3 + $0x304] ss:$16 sps:$4 sm:$0xff]   ;;  %v3542_v12 = vld [vmem:[%s4661_s3 + $0x30c] ss:$16 sps:$4 sm:$0xff]  }
 0x10c   :  { %2259 = vmatprep.subr.bf16.mxu0 %v3491_v16  ;;  %2341 = vmatprep.subr.bf16.mxu1 %v3494_v17  ;;  %v3537_v16 = vld [vmem:[%s4661_s3 + $0x300] ss:$16 sps:$4 sm:$0xff]   ;;  %v3540_v17 = vld [vmem:[%s4661_s3 + $0x308] ss:$16 sps:$4 sm:$0xff]  }
 0x1a1   :  { %v1414_v27 = vpop.f32.mrb[0].mxu0  ;;  %v4446_v28 = vpop.f32.mrb[0].mxu1 }
 0x1a2   :  { %v3051_v29 = vadd.f32 %v1414_v27, %v232_v24  ;;  %v1416_v30 = vpop.f32.mrb[1].mxu0  ;;  %v1580_v31 = vpop.f32.mrb[1].mxu1  ;;  %v3053_v13 = vadd.f32 %v4446_v28, %v240_v7  ;;  %v3543_v24 = vld [vmem:[%s4662_s5 + $0x80] sm:$0xff]   ;;  %v3547_v27 = vld [vmem:[%s4662_s5 + $0x48] sm:$0xff]  }
 0x1a3   :  { %v3052_v32 = vadd.f32 %v1416_v30, %v236_v25  ;;  %v3054_v33 = vadd.f32 %v1580_v31, %v244_v26  ;;  %v1418_v34 = vpop.f32.mrb[2].mxu0  ;;  %v1582_v35 = vpop.f32.mrb[2].mxu1  ;;  %v3545_v25 = vld [vmem:[%s4662_s5] sm:$0xff]   ;;  %v3546_v28 = vld [vmem:[%s4662_s5 + $0x88] sm:$0xff]   ;;  %v3550_v30 = vld [vmem:[%s4662_s5 + $0x50] sm:$0xff]  }
 0x1a4   :  { %v1585_v36 = vmax.f32 %v3051_v29, 0.0  ;;  %v1419_v37 = vpop.f32.mrb[3].mxu0  ;;  %v1583_v38 = vpop.f32.mrb[3].mxu1  ;;  %v1587_v18 = vmax.f32 %v3053_v13, 0.0  ;;  %v3548_v29 = vld [vmem:[%s4662_s5 + $0x8] sm:$0xff]   ;;  %v3549_v31 = vld [vmem:[%s4662_s5 + $0x90] sm:$0xff]  }
 0x1a5   :  { %v1586_v39 = vmax.f32 %v3052_v32, 0.0  ;;  %v1588_v40 = vmax.f32 %v3054_v33, 0.0  ;;  %v3551_v32 = vld [vmem:[%s4662_s5 + $0x10] sm:$0xff]   ;;  %v3553_v33 = vld [vmem:[%s4662_s5 + $0x58] sm:$0xff]   ;;  %v3555_v37 = vld [vmem:[%s4662_s5 + $0xa0] sm:$0xff]  }
 0x1a6   :  { %v1589_v44 = vpack.c.bf16 %v1585_v36, %v1585_v36  ;;  %v1591_v26 = vpack.c.bf16 %v1587_v18, %v1587_v18  ;;  %v3552_v34 = vld [vmem:[%s4662_s5 + $0x98] sm:$0xff]   ;;  %v3556_v36 = vld [vmem:[%s4662_s5 + $0x60] sm:$0xff]  }
 0x1a7   :  { %v1590_v41 = vpack.c.bf16 %v1586_v39, %v1586_v39  ;;  %v1592_v47 = vpack.c.bf16 %v1588_v40, %v1588_v40  ;;  %v3554_v35 = vld [vmem:[%s4662_s5 + $0x18] sm:$0xff]   ;;  %v3557_v38 = vld [vmem:[%s4662_s5 + $0x20] sm:$0xff]   ;;  %v3559_v39 = vld [vmem:[%s4662_s5 + $0x68] sm:$0xff]  }
 0x1a8   :  { %v3558_v40 = vld [vmem:[%s4662_s5 + $0xa8] sm:$0xff]   ;;  %v3002_v7 = vld [vmem:[%s4665_s6] ss:$0 sm:$0xff] }
 0x1a9   :  { %2250 = vmatprep.mubr.bf16.mxu0 %v1590_v41  ;;  %2332 = vmatprep.mubr.bf16.mxu1 %v1590_v41  ;;  %v3560_v41 = vld [vmem:[%s4662_s5 + $0x28] sm:$0xff]  }
 0x1aa   :  { %2251 = vmatmul.mubr.bf16.vlgmr.msra.gmra.mrb[4].mxu0 %v1589_v44  ;;  %2333 = vmatmul.mubr.bf16.vlgmr.msra.gmra.mrb[4].mxu1 %v1589_v44  ;;  %v3563_v44 = vld [vmem:[%s4662_s5 + $0x30] sm:$0xff]  }
 0x1ab   :  { %2260 = vmatpush1.bf16.msra.mxu0 %v3489_v42  ;;  %2342 = vmatpush1.bf16.msra.mxu1 %v3492_v43  ;;  %v3561_v42 = vld [vmem:[%s4662_s5 + $0xb0] sm:$0xff]  }
 0x1ac   :  { %3000 = vmatprep.mubr.msk.bf16.mxu0 %vm1253_vm0, %v1592_v47  ;;  %3001 = vmatprep.mubr.msk.bf16.mxu1 %vm1253_vm0, %v1592_v47  ;;  %v3562_v43 = vld [vmem:[%s4662_s5 + $0x70] sm:$0xff]   ;;  %v3566_v47 = vld [vmem:[%s4662_s5 + $0x38] sm:$0xff]  }
 0x1ad   :  { %2261 = vmatprep.subr.bf16.mxu0 %v3497_v45  ;;  %2343 = vmatprep.subr.bf16.mxu1 %v3500_v46  ;;  %v3564_v45 = vld [vmem:[%s4662_s5 + $0xb8] sm:$0xff]  }
 0x1ae   :  { %v3565_v46 = vld [vmem:[%s4662_s5 + $0x78] sm:$0xff]  }
 0x1af   :  { %2262 = vmatpush1.bf16.msra.mxu0 %v3495_v48  ;;  %2344 = vmatpush1.bf16.msra.mxu1 %v3498_v49  ;;  %v3567_v48 = vld [vmem:[%s4662_s5 + $0xc0] sm:$0xff]  }
 0x1b0   :  { %2263 = vmatprep.subr.bf16.mxu0 %v3503_v50  ;;  %2345 = vmatprep.subr.bf16.mxu1 %v3506_v51  ;;  %v1693_v49 = vld [vmem:[%s4664_s4] sm:$0xf] }
 0x1b1   :  { %v1698_v50 = vrot.slane %v1693_v49, %v231_v20  ;;  %v1702_v51 = vrot.slane %v1693_v49, %v235_v22 }
 0x1b3   :  { %2264 = vmatpush1.bf16.msra.mxu0 %v3501_v52  ;;  %2346 = vmatpush1.bf16.msra.mxu1 %v3504_v53  ;;  %v1710_v52 = vrot.slane %v1693_v49, %v243_v23 }
 0x1b4   :  { %2265 = vmatprep.subr.bf16.mxu0 %v3509_v54  ;;  %2347 = vmatprep.subr.bf16.mxu1 %v3512_v55 }
 0x1b7   :  { %2266 = vmatpush1.bf16.msra.mxu0 %v3507_v56  ;;  %2348 = vmatpush1.bf16.msra.mxu1 %v3510_v57 }
 0x1b8   :  { %2267 = vmatprep.subr.bf16.mxu0 %v3515_v58  ;;  %2349 = vmatprep.subr.bf16.mxu1 %v3518_v59 }
 0x1bb   :  { %2268 = vmatpush1.bf16.msra.mxu0 %v3513_v60  ;;  %2350 = vmatpush1.bf16.msra.mxu1 %v3516_v61 }
 0x1bc   :  { %2269 = vmatprep.subr.bf16.mxu0 %v3521_v62  ;;  %2351 = vmatprep.subr.bf16.mxu1 %v3524_v63 }
 0x1bf   :  { %2270 = vmatpush1.bf16.msra.mxu0 %v3519_v0  ;;  %2352 = vmatpush1.bf16.msra.mxu1 %v3522_v1 }
 0x1c0   :  { %2271 = vmatprep.subr.bf16.mxu0 %v3527_v3  ;;  %2353 = vmatprep.subr.bf16.mxu1 %v3530_v4 }
 0x1c3   :  { %2272 = vmatpush1.bf16.msra.mxu0 %v3525_v5  ;;  %2354 = vmatpush1.bf16.msra.mxu1 %v3528_v6 }
 0x1c4   :  { %2273 = vmatprep.subr.bf16.mxu0 %v3533_v8  ;;  %2355 = vmatprep.subr.bf16.mxu1 %v3536_v9 }
 0x1c7   :  { %2274 = vmatpush1.bf16.msra.mxu0 %v3531_v10  ;;  %2356 = vmatpush1.bf16.msra.mxu1 %v3534_v11 }
 0x1c8   :  { %2275 = vmatprep.subr.bf16.mxu0 %v3539_v14  ;;  %2357 = vmatprep.subr.bf16.mxu1 %v3542_v12 }
 0x1cb   :  { %2276 = vmatpush1.bf16.msra.mxu0 %v3537_v16  ;;  %2358 = vmatpush1.bf16.msra.mxu1 %v3540_v17 }
 0x1cc   :  { %2640 = vmatprep.subr.bf16.mxu1 %v3572_v15  ;;  %3029 = vmatprep.subr.bf16.mxu0 %v3544_v21 }
 0x1ce   :  { %2292 = vmatmul.mubr.bf16.vlgmr.msra.gmra.mrb[4].mxu0 %v1591_v26  ;;  %2374 = vmatmul.mubr.bf16.vlgmr.msra.gmra.mrb[4].mxu1 %v1591_v26 }
 0x1cf   :  { %2641 = vmatpush1.bf16.msra.mxu1 %v3543_v24  ;;  %3030 = vmatpush3.bf16.msra.mxu0 %v3545_v25 }
 0x1d0   :  { %2642 = vmatprep.subr.bf16.mxu1 %v3572_v15  ;;  %3031 = vmatprep.subr.bf16.mxu0 %v3547_v27 }
 0x1d3   :  { %2643 = vmatpush1.bf16.msra.mxu1 %v3546_v28  ;;  %3032 = vmatpush3.bf16.msra.mxu0 %v3548_v29 }
 0x1d4   :  { %2644 = vmatprep.subr.bf16.mxu1 %v3572_v15  ;;  %3033 = vmatprep.subr.bf16.mxu0 %v3550_v30 }
 0x1d7   :  { %2645 = vmatpush1.bf16.msra.mxu1 %v3549_v31  ;;  %3034 = vmatpush3.bf16.msra.mxu0 %v3551_v32 }
 0x1d8   :  { %2646 = vmatprep.subr.bf16.mxu1 %v3572_v15  ;;  %3035 = vmatprep.subr.bf16.mxu0 %v3553_v33 }
 0x1db   :  { %2647 = vmatpush1.bf16.msra.mxu1 %v3552_v34  ;;  %3036 = vmatpush3.bf16.msra.mxu0 %v3554_v35 }
 0x1dc   :  { %2648 = vmatprep.subr.bf16.mxu1 %v3572_v15  ;;  %3037 = vmatprep.subr.bf16.mxu0 %v3556_v36 }
 0x1df   :  { %2649 = vmatpush1.bf16.msra.mxu1 %v3555_v37  ;;  %3038 = vmatpush3.bf16.msra.mxu0 %v3557_v38 }
 0x1e0   :  { %2650 = vmatprep.subr.bf16.mxu1 %v3572_v15  ;;  %3039 = vmatprep.subr.bf16.mxu0 %v3559_v39 }
 0x1e3   :  { %2651 = vmatpush1.bf16.msra.mxu1 %v3558_v40  ;;  %3040 = vmatpush3.bf16.msra.mxu0 %v3560_v41 }
 0x1e4   :  { %2652 = vmatprep.subr.bf16.mxu1 %v3572_v15  ;;  %3041 = vmatprep.subr.bf16.mxu0 %v3562_v43 }
 0x1e7   :  { %2653 = vmatpush1.bf16.msra.mxu1 %v3561_v42  ;;  %3042 = vmatpush3.bf16.msra.mxu0 %v3563_v44 }
 0x1e8   :  { %2654 = vmatprep.subr.bf16.mxu1 %v3572_v15  ;;  %3043 = vmatprep.subr.bf16.mxu0 %v3565_v46 }
 0x1eb   :  { %2655 = vmatpush1.bf16.msra.mxu1 %v3564_v45  ;;  %3044 = vmatpush3.bf16.msra.mxu0 %v3566_v47 }
 0x1ec   :  { %2656 = vmatprep.subr.bf16.mxu1 %v3572_v15  ;;  %v1706_v15 = vrot.slane %v1693_v49, %v239_v2 }
 0x1ef   :  { %2657 = vmatpush1.bf16.msra.mxu1 %v3567_v48 }
 0x2a1   :  { %v2293_v53 = vpop.f32.mrb[4].mxu0  ;;  %v2375_v54 = vpop.f32.mrb[4].mxu1 }
 0x2a2   :  { %v3055_v55 = vadd.f32 %v2293_v53, %v1698_v50  ;;  %v3057_v56 = vadd.f32 %v2375_v54, %v1706_v15  ;;  %v2295_v57 = vpop.f32.mrb[5].mxu0  ;;  %v2377_v58 = vpop.f32.mrb[5].mxu1 }
 0x2a3   :  { %v3056_v59 = vadd.f32 %v2295_v57, %v1702_v51  ;;  %v3058_v60 = vadd.f32 %v2377_v58, %v1710_v52  ;;  %v2297_v61 = vpop.f32.mrb[6].mxu0  ;;  %v2379_v62 = vpop.f32.mrb[6].mxu1 }
 0x2a4   :  { %v2382_v20 = vmax.f32 %v3055_v55, 0.0  ;;  %v2384_v63 = vmax.f32 %v3057_v56, 0.0  ;;  %v2298_v0 = vpop.f32.mrb[7].mxu0  ;;  %v2380_v1 = vpop.f32.mrb[7].mxu1 }
 0x2a5   :  { %v2383_v2 = vmax.f32 %v3056_v59, 0.0  ;;  %v2385_v3 = vmax.f32 %v3058_v60, 0.0 }
 0x2a6   :  { %v2386_v19 = vpack.c.bf16 %v2382_v20, %v2382_v20  ;;  %v2388_v23 = vpack.c.bf16 %v2384_v63, %v2384_v63 }
 0x2a7   :  { %v2387_v22 = vpack.c.bf16 %v2383_v2, %v2383_v2  ;;  %v2389_v4 = vpack.c.bf16 %v2385_v3, %v2385_v3 }
 0x2a9   :  { %2632 = vmatprep.mubr.bf16.mxu0 %v2387_v22  ;;  %3028 = vmatprep.mubr.msk.bf16.mxu1 %vm1253_vm0, %v2389_v4 }
 0x2aa   :  { %2633 = vmatmul.mubr.bf16.vlgmr.msra.gmra.mrb[8].mxu0 %v2386_v19  ;;  %2673 = vmatmul.mubr.bf16.vlgmr.msra.gmra.mrb[8].mxu1 %v2388_v23 }
 0x37d   :  { %v3045_v5 = vpop.f32.mrb[8].mxu0  ;;  %v2674_v6 = vpop.f32.mrb[8].mxu1 }
 0x37e   :  { %v3046_v8 = vpop.f32.mrb[9].mxu0  ;;  %v2676_v9 = vpop.f32.mrb[9].mxu1 }
 0x37f   :  { %v3047_v10 = vadd.f32 %v3046_v8, %v3045_v5  ;;  %v3048_v11 = vpop.f32.mrb[10].mxu0  ;;  %v2677_v13 = vpop.f32.mrb[10].mxu1 }
 0x380   :  { %v3049_v14 = vpop.f32.mrb[11].mxu0  ;;  %v2678_v12 = vpop.f32.mrb[11].mxu1 }
 0x381   :  { %v2635_v16 = vadd.f32 %v3047_v10, %v3002_v7 }
 0x383   :  { %v2675_v17 = vadd.f32 %v2674_v6, %v2635_v16 }
 0x385   :  { %2680 = vmax.xlane.f32.xlu0 %v2675_v17 }
 0x412   :  { %v2681_v18 = vpop.xlane.xlu0 %2680 }
 0x413   :  { %v2682_v21 = vsub.f32 %v2675_v17, %v2681_v18 }
 0x415   :  { %v2683_v24 = vmul.f32 1.442695, %v2682_v21 }
 0x417   :  { %3568 = vpow2.f32 %v2683_v24 }
 0x421   :  { %v3569_v25 = vpop.eup %3568 }
 0x422   :  { %2685 = vadd.xlane.f32.xlu0 %v3569_v25 }
 0x4af   :  { %v2686_v26 = vpop.xlane.xlu0 %2685 }
 0x4b0   :  { %3570 = vlog2.f32 %v2686_v26 }
 0x4ba   :  { %v3571_v27 = vpop.eup %3570 }
 0x4bb   :  { %v2688_v28 = vmul.f32 0.6931472, %v3571_v27 }
 0x4bd   :  { %v2689_v29 = vsub.f32 %v2682_v21, %v2688_v28 }
 0x4bf   :  { %2690 = vst [vmem:[%s4666_s7] sm:$0xff] %v2689_v29 }

</bundles_post_ra>
